<compile_context>
chip_gen: v7x
topology: tpu7x:2x2x1
jax: 0.10.0
libtpu: 0.0.40
codegen_flags: <defaults>
</compile_context>

<pallas_src>
import functools

import jax
import jax.numpy as jnp
from jax import lax
from jax.experimental import pallas as pl
from jax.experimental.pallas import tpu as pltpu

BN_EPS = 1e-5
CP = 128  # lane-padded channel count (output channels padded to 128 lanes)


# ----------------------------- Pallas kernels -------------------------------

def _conv1_tile(xs_ref, w1_ref, b1_ref, oh, ow, k1, cp):
    """conv_1 for one image as 4 tap-accumulated matmuls on the space-to-depth
    input. xs_ref: (1, oh+1, ow+1, k1), w1_ref: (4, k1, cp), b1_ref: (1, cp).
    Returns (oh*ow, cp) f32 (pre-BN, bias included)."""
    acc = jnp.zeros((oh * ow, cp), jnp.float32)
    for a in range(2):
        for b in range(2):
            win = xs_ref[0, a:a + oh, b:b + ow, :].reshape(oh * ow, k1)
            acc = acc + jnp.dot(win, w1_ref[a * 2 + b],
                                preferred_element_type=jnp.float32)
    return acc + b1_ref[...]


def conv1_stats_kernel(xs_ref, w1_ref, b1_ref, stats_ref, *, oh, ow, k1, cp):
    """Phase 1: conv_1 per image + accumulate per-channel sum / sum-of-squares
    across the grid into a resident (2, cp) output block."""
    y1 = _conv1_tile(xs_ref, w1_ref, b1_ref, oh, ow, k1, cp)
    part = jnp.concatenate(
        [jnp.sum(y1, axis=0, keepdims=True),
         jnp.sum(y1 * y1, axis=0, keepdims=True)], axis=0)  # (2, cp)

    @pl.when(pl.program_id(0) == 0)
    def _init():
        stats_ref[...] = jnp.zeros_like(stats_ref)

    stats_ref[...] += part


def fused_bn_conv2_kernel(xs_ref, w1_ref, b1_ref, scale_ref, shift_ref,
                          w2_ref, b2_ref, o_ref, z1p_ref, *, oh, ow, k1, cp):
    """Phase 2: recompute conv_1, apply folded BN (scale/shift) + ReLU, then
    conv_2 (3x3, pad 1) + ReLU, all in VMEM. z1p_ref is a (oh+2, ow+2, cp)
    scratch holding the zero-padded intermediate activation."""
    y1 = _conv1_tile(xs_ref, w1_ref, b1_ref, oh, ow, k1, cp)
    z1 = jnp.maximum(y1 * scale_ref[...] + shift_ref[...], 0.0)

    # zero halo + interior write; the whole 3x3 conv reads stay in VMEM.
    z1p_ref[...] = jnp.zeros_like(z1p_ref)
    z1p_ref[1:1 + oh, 1:1 + ow, :] = z1.reshape(oh, ow, cp)

    acc = jnp.zeros((oh * ow, cp), jnp.float32)
    for dh in range(3):
        for dw in range(3):
            win = z1p_ref[dh:dh + oh, dw:dw + ow, :].reshape(oh * ow, cp)
            acc = acc + jnp.dot(win, w2_ref[dh * 3 + dw],
                                preferred_element_type=jnp.float32)
    o_ref[0] = jnp.maximum(acc + b2_ref[...], 0.0)


# ------------------------------ JAX glue -------------------------------------

def _pad_channels(v, cp):
    return jnp.pad(v, (0, cp - v.shape[0]))


@jax.jit
def downsample_x2(x_nchw, params):
    w1, b1, gamma, beta, w2, b2 = params
    cout, cin = int(w1.shape[0]), int(w1.shape[1])
    n, _, h, w = x_nchw.shape
    assert h % 2 == 0 and w % 2 == 0
    oh, ow = h // 2, w // 2
    k1 = 4 * cin  # contraction depth per conv_1 tap (4 spatial parities x cin)

    # ---- layout-only glue (no im2col blow-up) -------------------------------
    x = jnp.transpose(x_nchw, (0, 2, 3, 1)).astype(jnp.float32)      # NHWC
    xp = jnp.pad(x, ((0, 0), (1, 1), (1, 1), (0, 0)))                # pad=1
    # space-to-depth of the padded input: 4x4/s2 conv == 2x2/s1 conv over this.
    xs = jnp.concatenate(
        [xp[:, r::2, s::2, :] for r in (0, 1) for s in (0, 1)],
        axis=-1)                                                     # (N, oh+1, ow+1, k1)

    # conv_1 weights as 4 taps of (k1, CP); output channels zero-padded to CP.
    w1_hwio = jnp.pad(jnp.transpose(w1, (2, 3, 1, 0)),
                      ((0, 0), (0, 0), (0, 0), (0, CP - cout)))      # (4,4,cin,CP)
    w1t = jnp.stack(
        [jnp.concatenate([w1_hwio[2 * a + r, 2 * b + s]
                          for r in (0, 1) for s in (0, 1)], axis=0)
         for a in (0, 1) for b in (0, 1)], axis=0)                   # (4, k1, CP)

    # conv_2 weights as 9 taps of (CP, CP) (both channel dims zero-padded).
    w2_hwio = jnp.pad(jnp.transpose(w2, (2, 3, 1, 0)),
                      ((0, 0), (0, 0), (0, CP - cout), (0, CP - cout)))
    w2t = w2_hwio.reshape(9, CP, CP)

    b1p = _pad_channels(b1, CP).reshape(1, CP)
    b2p = _pad_channels(b2, CP).reshape(1, CP)
    gammap = _pad_channels(gamma, CP)
    betap = _pad_channels(beta, CP)

    m_total = n * oh * ow
    flops1 = 2 * m_total * (16 * cin) * CP
    bytes1 = 4 * (xs.size + w1t.size + b1p.size + 2 * CP)
    flops2 = flops1 + 2 * m_total * (9 * CP) * CP
    bytes2 = 4 * (xs.size + w1t.size + w2t.size + 4 * CP + m_total * CP)

    # ---- phase 1: conv_1 + BN statistics accumulation ------------------------
    stats = pl.pallas_call(
        functools.partial(conv1_stats_kernel, oh=oh, ow=ow, k1=k1, cp=CP),
        out_shape=jax.ShapeDtypeStruct((2, CP), jnp.float32),
        grid_spec=pltpu.PrefetchScalarGridSpec(
            num_scalar_prefetch=0,
            grid=(n,),
            in_specs=[
                pl.BlockSpec((1, oh + 1, ow + 1, k1), lambda i: (i, 0, 0, 0)),
                pl.BlockSpec((4, k1, CP), lambda i: (0, 0, 0)),
                pl.BlockSpec((1, CP), lambda i: (0, 0)),
            ],
            out_specs=pl.BlockSpec((2, CP), lambda i: (0, 0)),
        ),
        compiler_params=pltpu.CompilerParams(
            dimension_semantics=("arbitrary",)),
        cost_estimate=pl.CostEstimate(flops=flops1, transcendentals=0,
                                      bytes_accessed=bytes1),
    )(xs, w1t, b1p)

    # fold BN (biased batch stats, training mode) into per-channel scale/shift.
    count = float(m_total)
    mean = stats[0] / count
    var = jnp.maximum(stats[1] / count - mean * mean, 0.0)
    inv = lax.rsqrt(var + BN_EPS)
    scale_c = gammap * inv
    shift_c = betap - mean * scale_c
    scale = scale_c.reshape(1, CP)
    shift = shift_c.reshape(1, CP)

    # ---- phase 2: conv_1 (recompute) + BN + ReLU + conv_2 + ReLU, fused ------
    y2 = pl.pallas_call(
        functools.partial(fused_bn_conv2_kernel, oh=oh, ow=ow, k1=k1, cp=CP),
        out_shape=jax.ShapeDtypeStruct((n, oh * ow, CP), jnp.float32),
        grid_spec=pltpu.PrefetchScalarGridSpec(
            num_scalar_prefetch=0,
            grid=(n,),
            in_specs=[
                pl.BlockSpec((1, oh + 1, ow + 1, k1), lambda i: (i, 0, 0, 0)),
                pl.BlockSpec((4, k1, CP), lambda i: (0, 0, 0)),
                pl.BlockSpec((1, CP), lambda i: (0, 0)),
                pl.BlockSpec((1, CP), lambda i: (0, 0)),
                pl.BlockSpec((1, CP), lambda i: (0, 0)),
                pl.BlockSpec((9, CP, CP), lambda i: (0, 0, 0)),
                pl.BlockSpec((1, CP), lambda i: (0, 0)),
            ],
            out_specs=pl.BlockSpec((1, oh * ow, CP), lambda i: (i, 0, 0)),
            scratch_shapes=[pltpu.VMEM((oh + 2, ow + 2, CP), jnp.float32)],
        ),
        compiler_params=pltpu.CompilerParams(
            dimension_semantics=("parallel",)),
        cost_estimate=pl.CostEstimate(flops=flops2, transcendentals=0,
                                      bytes_accessed=bytes2),
    )(xs, w1t, b1p, scale, shift, w2t, b2p)

    y2 = y2.reshape(n, oh, ow, CP)[:, :, :, :cout]
    return jnp.transpose(y2, (0, 3, 1, 2))  # NHWC -> NCHW


# --------------------------- pure-JAX reference -------------------------------

def reference(x_nchw, params):
    w1, b1, gamma, beta, w2, b2 = params
    x = jnp.transpose(x_nchw, (0, 2, 3, 1)).astype(jnp.float32)
    dn = ("NHWC", "HWIO", "NHWC")
    y = lax.conv_general_dilated(x, jnp.transpose(w1, (2, 3, 1, 0)), (2, 2),
                                 ((1, 1), (1, 1)), dimension_numbers=dn) + b1
    mean = jnp.mean(y, axis=(0, 1, 2))
    var = jnp.mean((y - mean) ** 2, axis=(0, 1, 2))
    y = gamma * (y - mean) / jnp.sqrt(var + BN_EPS) + beta
    y = jnp.maximum(y, 0.0)
    y = lax.conv_general_dilated(y, jnp.transpose(w2, (2, 3, 1, 0)), (1, 1),
                                 ((1, 1), (1, 1)), dimension_numbers=dn) + b2
    y = jnp.maximum(y, 0.0)
    return jnp.transpose(y, (0, 3, 1, 2))


# ---------------------------------- main --------------------------------------

def init_params(key, in_channels, out_channels):
    k1, k2, k3, k4 = jax.random.split(key, 4)
    fan1 = in_channels * 4 * 4
    fan2 = out_channels * 3 * 3
    lim1 = 1.0 / jnp.sqrt(fan1)
    lim2 = 1.0 / jnp.sqrt(fan2)
    w1 = jax.random.uniform(k1, (out_channels, in_channels, 4, 4),
                            jnp.float32, -lim1, lim1)
    b1 = jax.random.uniform(k2, (out_channels,), jnp.float32, -lim1, lim1)
    w2 = jax.random.uniform(k3, (out_channels, out_channels, 3, 3),
                            jnp.float32, -lim2, lim2)
    b2 = jax.random.uniform(k4, (out_channels,), jnp.float32, -lim2, lim2)
    gamma = jnp.ones((out_channels,), jnp.float32)   # BatchNorm2d default init
    beta = jnp.zeros((out_channels,), jnp.float32)
    return (w1, b1, gamma, beta, w2, b2)


if __name__ == "__main__":
    key = jax.random.PRNGKey(0)
    kx, kp = jax.random.split(key)
    N, Cin, Cout, H, W = 2, 4, 8, 16, 16
    x = jax.random.normal(kx, (N, Cin, H, W), jnp.float32)  # NCHW like PyTorch
    params = init_params(kp, Cin, Cout)

    out = jax.block_until_ready(downsample_x2(x, params))

    ref = reference(x, params)
    assert out.shape == (N, Cout, H // 2, W // 2), out.shape
    max_err = float(jnp.max(jnp.abs(out - ref)))
    assert jnp.allclose(out, ref, atol=2e-4, rtol=2e-4), max_err
    print("KERNEL_OK")
</pallas_src>

<mosaic_0001>
module attributes {stable_mosaic.version = 11 : i64} {
  func.func @conv1_stats_kernel(%arg0: i32, %arg1: memref<1x9x9x16xf32, #tpu.memory_space<vmem>>, %arg2: memref<4x16x128xf32, #tpu.memory_space<vmem>>, %arg3: memref<1x128xf32, #tpu.memory_space<vmem>>, %arg4: memref<2x128xf32, #tpu.memory_space<vmem>>) attributes {dimension_semantics = [#tpu.dimension_semantics<arbitrary>], iteration_bounds = array<i64: 2>, scalar_prefetch = 0 : i64, scratch_operands = 0 : i64, tpu.core_type = #tpu.core_type<tc>, window_params = [{transform_indices = @transform_0, window_bounds = array<i64: 1, 9, 9, 16>}, {pipeline_mode = #tpu.pipeline_mode<synchronous>, transform_indices = @transform_1, window_bounds = array<i64: 4, 16, 128>}, {pipeline_mode = #tpu.pipeline_mode<synchronous>, transform_indices = @transform_2, window_bounds = array<i64: 1, 128>}, {pipeline_mode = #tpu.pipeline_mode<synchronous>, transform_indices = @transform_3, window_bounds = array<i64: 2, 128>}]} {
    %cst = arith.constant 0.000000e+00 : f32
    %0 = vector.broadcast %cst : f32 to vector<64x128xf32>
    %c0 = arith.constant 0 : index
    %c0_0 = arith.constant 0 : index
    %c0_1 = arith.constant 0 : index
    %c0_2 = arith.constant 0 : index
    %1 = vector.load %arg1[%c0, %c0_0, %c0_1, %c0_2] : memref<1x9x9x16xf32, #tpu.memory_space<vmem>>, vector<1x8x8x16xf32>
    %2 = vector.shape_cast %1 : vector<1x8x8x16xf32> to vector<8x8x16xf32>
    %3 = vector.shape_cast %2 : vector<8x8x16xf32> to vector<64x16xf32>
    %c0_3 = arith.constant 0 : index
    %c0_4 = arith.constant 0 : index
    %c0_5 = arith.constant 0 : index
    %4 = vector.load %arg2[%c0_3, %c0_4, %c0_5] : memref<4x16x128xf32, #tpu.memory_space<vmem>>, vector<1x16x128xf32>
    %5 = vector.shape_cast %4 : vector<1x16x128xf32> to vector<16x128xf32>
    %cst_6 = arith.constant dense<0.000000e+00> : vector<64x128xf32>
    %6 = tpu.matmul %3, %5, %cst_6 {dimension_numbers = #tpu.dot_dimension_numbers<[1], [0], [0], [1], [0, 0, 1, 1], [], []>} : vector<64x16xf32>, vector<16x128xf32>, vector<64x128xf32> -> vector<64x128xf32>
    %7 = arith.addf %0, %6 : vector<64x128xf32>
    %c0_7 = arith.constant 0 : index
    %c0_8 = arith.constant 0 : index
    %c1 = arith.constant 1 : index
    %c0_9 = arith.constant 0 : index
    %8 = vector.load %arg1[%c0_7, %c0_8, %c1, %c0_9] : memref<1x9x9x16xf32, #tpu.memory_space<vmem>>, vector<1x8x8x16xf32>
    %9 = vector.shape_cast %8 : vector<1x8x8x16xf32> to vector<8x8x16xf32>
    %10 = vector.shape_cast %9 : vector<8x8x16xf32> to vector<64x16xf32>
    %c1_10 = arith.constant 1 : index
    %c0_11 = arith.constant 0 : index
    %c0_12 = arith.constant 0 : index
    %11 = vector.load %arg2[%c1_10, %c0_11, %c0_12] : memref<4x16x128xf32, #tpu.memory_space<vmem>>, vector<1x16x128xf32>
    %12 = vector.shape_cast %11 : vector<1x16x128xf32> to vector<16x128xf32>
    %cst_13 = arith.constant dense<0.000000e+00> : vector<64x128xf32>
    %13 = tpu.matmul %10, %12, %cst_13 {dimension_numbers = #tpu.dot_dimension_numbers<[1], [0], [0], [1], [0, 0, 1, 1], [], []>} : vector<64x16xf32>, vector<16x128xf32>, vector<64x128xf32> -> vector<64x128xf32>
    %14 = arith.addf %7, %13 : vector<64x128xf32>
    %c0_14 = arith.constant 0 : index
    %c1_15 = arith.constant 1 : index
    %c0_16 = arith.constant 0 : index
    %c0_17 = arith.constant 0 : index
    %15 = vector.load %arg1[%c0_14, %c1_15, %c0_16, %c0_17] : memref<1x9x9x16xf32, #tpu.memory_space<vmem>>, vector<1x8x8x16xf32>
    %16 = vector.shape_cast %15 : vector<1x8x8x16xf32> to vector<8x8x16xf32>
    %17 = vector.shape_cast %16 : vector<8x8x16xf32> to vector<64x16xf32>
    %c2 = arith.constant 2 : index
    %c0_18 = arith.constant 0 : index
    %c0_19 = arith.constant 0 : index
    %18 = vector.load %arg2[%c2, %c0_18, %c0_19] : memref<4x16x128xf32, #tpu.memory_space<vmem>>, vector<1x16x128xf32>
    %19 = vector.shape_cast %18 : vector<1x16x128xf32> to vector<16x128xf32>
    %cst_20 = arith.constant dense<0.000000e+00> : vector<64x128xf32>
    %20 = tpu.matmul %17, %19, %cst_20 {dimension_numbers = #tpu.dot_dimension_numbers<[1], [0], [0], [1], [0, 0, 1, 1], [], []>} : vector<64x16xf32>, vector<16x128xf32>, vector<64x128xf32> -> vector<64x128xf32>
    %21 = arith.addf %14, %20 : vector<64x128xf32>
    %c0_21 = arith.constant 0 : index
    %c1_22 = arith.constant 1 : index
    %c1_23 = arith.constant 1 : index
    %c0_24 = arith.constant 0 : index
    %22 = vector.load %arg1[%c0_21, %c1_22, %c1_23, %c0_24] : memref<1x9x9x16xf32, #tpu.memory_space<vmem>>, vector<1x8x8x16xf32>
    %23 = vector.shape_cast %22 : vector<1x8x8x16xf32> to vector<8x8x16xf32>
    %24 = vector.shape_cast %23 : vector<8x8x16xf32> to vector<64x16xf32>
    %c3 = arith.constant 3 : index
    %c0_25 = arith.constant 0 : index
    %c0_26 = arith.constant 0 : index
    %25 = vector.load %arg2[%c3, %c0_25, %c0_26] : memref<4x16x128xf32, #tpu.memory_space<vmem>>, vector<1x16x128xf32>
    %26 = vector.shape_cast %25 : vector<1x16x128xf32> to vector<16x128xf32>
    %cst_27 = arith.constant dense<0.000000e+00> : vector<64x128xf32>
    %27 = tpu.matmul %24, %26, %cst_27 {dimension_numbers = #tpu.dot_dimension_numbers<[1], [0], [0], [1], [0, 0, 1, 1], [], []>} : vector<64x16xf32>, vector<16x128xf32>, vector<64x128xf32> -> vector<64x128xf32>
    %28 = arith.addf %21, %27 : vector<64x128xf32>
    %c0_28 = arith.constant 0 : index
    %c0_29 = arith.constant 0 : index
    %29 = vector.load %arg3[%c0_28, %c0_29] : memref<1x128xf32, #tpu.memory_space<vmem>>, vector<1x128xf32>
    %30 = vector.broadcast %29 : vector<1x128xf32> to vector<64x128xf32>
    %31 = arith.addf %28, %30 : vector<64x128xf32>
    %cst_30 = arith.constant dense<0.000000e+00> : vector<128xf32>
    %32 = vector.multi_reduction <add>, %31, %cst_30 [0] : vector<64x128xf32> to vector<128xf32>
    %33 = vector.shape_cast %32 : vector<128xf32> to vector<1x128xf32>
    %34 = arith.mulf %31, %31 : vector<64x128xf32>
    %cst_31 = arith.constant dense<0.000000e+00> : vector<128xf32>
    %35 = vector.multi_reduction <add>, %34, %cst_31 [0] : vector<64x128xf32> to vector<128xf32>
    %36 = vector.shape_cast %35 : vector<128xf32> to vector<1x128xf32>
    %37 = tpu.concatenate %33, %36 in 0 : vector<1x128xf32>, vector<1x128xf32> -> vector<2x128xf32>
    %c0_i32 = arith.constant 0 : i32
    %38 = arith.cmpi eq, %arg0, %c0_i32 : i32
    %39 = arith.extui %38 : i1 to i32
    %c0_i32_32 = arith.constant 0 : i32
    %40 = arith.cmpi ne, %39, %c0_i32_32 : i32
    scf.if %40 {
      %cst_37 = arith.constant 0.000000e+00 : f32
      %44 = vector.broadcast %cst_37 : f32 to vector<2x128xf32>
      %c0_38 = arith.constant 0 : index
      %c0_39 = arith.constant 0 : index
      %45 = vector.load %arg4[%c0_38, %c0_39] : memref<2x128xf32, #tpu.memory_space<vmem>>, vector<2x128xf32>
      tpu.vector_store %arg4[%c0_38, %c0_39], %44 {strides = array<i32>} : memref<2x128xf32, #tpu.memory_space<vmem>>, vector<2x128xf32>,
    } else {
    }
    %c0_33 = arith.constant 0 : index
    %c0_34 = arith.constant 0 : index
    %41 = vector.load %arg4[%c0_33, %c0_34] : memref<2x128xf32, #tpu.memory_space<vmem>>, vector<2x128xf32>
    %42 = arith.addf %41, %37 : vector<2x128xf32>
    %c0_35 = arith.constant 0 : index
    %c0_36 = arith.constant 0 : index
    %43 = vector.load %arg4[%c0_35, %c0_36] : memref<2x128xf32, #tpu.memory_space<vmem>>, vector<2x128xf32>
    tpu.vector_store %arg4[%c0_35, %c0_36], %42 {strides = array<i32>} : memref<2x128xf32, #tpu.memory_space<vmem>>, vector<2x128xf32>,
    return
  }
  func.func @transform_0(%arg0: i32) -> (i32, i32, i32, i32) {
    %c0_i32 = arith.constant 0 : i32
    %c0_i32_0 = arith.constant 0 : i32
    %c0_i32_1 = arith.constant 0 : i32
    %c0_i32_2 = arith.constant 0 : i32
    return %arg0, %c0_i32, %c0_i32_0, %c0_i32_1 : i32, i32, i32, i32
  }
  func.func @transform_1(%arg0: i32) -> (i32, i32, i32) {
    %c0_i32 = arith.constant 0 : i32
    %c0_i32_0 = arith.constant 0 : i32
    %c0_i32_1 = arith.constant 0 : i32
    %c0_i32_2 = arith.constant 0 : i32
    return %c0_i32, %c0_i32_0, %c0_i32_1 : i32, i32, i32
  }
  func.func @transform_2(%arg0: i32) -> (i32, i32) {
    %c0_i32 = arith.constant 0 : i32
    %c0_i32_0 = arith.constant 0 : i32
    %c0_i32_1 = arith.constant 0 : i32
    return %c0_i32, %c0_i32_0 : i32, i32
  }
  func.func @transform_3(%arg0: i32) -> (i32, i32) {
    %c0_i32 = arith.constant 0 : i32
    %c0_i32_0 = arith.constant 0 : i32
    %c0_i32_1 = arith.constant 0 : i32
    return %c0_i32, %c0_i32_0 : i32, i32
  }
}

module attributes {stable_mosaic.version = 11 : i64} {
  func.func @fused_bn_conv2_kernel(%arg0: i32, %arg1: memref<1x9x9x16xf32, #tpu.memory_space<vmem>>, %arg2: memref<4x16x128xf32, #tpu.memory_space<vmem>>, %arg3: memref<1x128xf32, #tpu.memory_space<vmem>>, %arg4: memref<1x128xf32, #tpu.memory_space<vmem>>, %arg5: memref<1x128xf32, #tpu.memory_space<vmem>>, %arg6: memref<9x128x128xf32, #tpu.memory_space<vmem>>, %arg7: memref<1x128xf32, #tpu.memory_space<vmem>>, %arg8: memref<1x64x128xf32, #tpu.memory_space<vmem>>, %arg9: memref<10x10x128xf32, #tpu.memory_space<vmem>>) attributes {dimension_semantics = [#tpu.dimension_semantics<parallel>], iteration_bounds = array<i64: 2>, scalar_prefetch = 0 : i64, scratch_operands = 1 : i64, tpu.core_type = #tpu.core_type<tc>, window_params = [{transform_indices = @transform_0, window_bounds = array<i64: 1, 9, 9, 16>}, {pipeline_mode = #tpu.pipeline_mode<synchronous>, transform_indices = @transform_1, window_bounds = array<i64: 4, 16, 128>}, {pipeline_mode = #tpu.pipeline_mode<synchronous>, transform_indices = @transform_2, window_bounds = array<i64: 1, 128>}, {pipeline_mode = #tpu.pipeline_mode<synchronous>, transform_indices = @transform_3, window_bounds = array<i64: 1, 128>}, {pipeline_mode = #tpu.pipeline_mode<synchronous>, transform_indices = @transform_4, window_bounds = array<i64: 1, 128>}, {pipeline_mode = #tpu.pipeline_mode<synchronous>, transform_indices = @transform_5, window_bounds = array<i64: 9, 128, 128>}, {pipeline_mode = #tpu.pipeline_mode<synchronous>, transform_indices = @transform_6, window_bounds = array<i64: 1, 128>}, {transform_indices = @transform_7, window_bounds = array<i64: 1, 64, 128>}]} {
    %cst = arith.constant 0.000000e+00 : f32
    %0 = vector.broadcast %cst : f32 to vector<64x128xf32>
    %c0 = arith.constant 0 : index
    %c0_0 = arith.constant 0 : index
    %c0_1 = arith.constant 0 : index
    %c0_2 = arith.constant 0 : index
    %1 = vector.load %arg1[%c0, %c0_0, %c0_1, %c0_2] : memref<1x9x9x16xf32, #tpu.memory_space<vmem>>, vector<1x8x8x16xf32>
    %2 = vector.shape_cast %1 : vector<1x8x8x16xf32> to vector<8x8x16xf32>
    %3 = vector.shape_cast %2 : vector<8x8x16xf32> to vector<64x16xf32>
    %c0_3 = arith.constant 0 : index
    %c0_4 = arith.constant 0 : index
    %c0_5 = arith.constant 0 : index
    %4 = vector.load %arg2[%c0_3, %c0_4, %c0_5] : memref<4x16x128xf32, #tpu.memory_space<vmem>>, vector<1x16x128xf32>
    %5 = vector.shape_cast %4 : vector<1x16x128xf32> to vector<16x128xf32>
    %cst_6 = arith.constant dense<0.000000e+00> : vector<64x128xf32>
    %6 = tpu.matmul %3, %5, %cst_6 {dimension_numbers = #tpu.dot_dimension_numbers<[1], [0], [0], [1], [0, 0, 1, 1], [], []>} : vector<64x16xf32>, vector<16x128xf32>, vector<64x128xf32> -> vector<64x128xf32>
    %7 = arith.addf %0, %6 : vector<64x128xf32>
    %c0_7 = arith.constant 0 : index
    %c0_8 = arith.constant 0 : index
    %c1 = arith.constant 1 : index
    %c0_9 = arith.constant 0 : index
    %8 = vector.load %arg1[%c0_7, %c0_8, %c1, %c0_9] : memref<1x9x9x16xf32, #tpu.memory_space<vmem>>, vector<1x8x8x16xf32>
    %9 = vector.shape_cast %8 : vector<1x8x8x16xf32> to vector<8x8x16xf32>
    %10 = vector.shape_cast %9 : vector<8x8x16xf32> to vector<64x16xf32>
    %c1_10 = arith.constant 1 : index
    %c0_11 = arith.constant 0 : index
    %c0_12 = arith.constant 0 : index
    %11 = vector.load %arg2[%c1_10, %c0_11, %c0_12] : memref<4x16x128xf32, #tpu.memory_space<vmem>>, vector<1x16x128xf32>
    %12 = vector.shape_cast %11 : vector<1x16x128xf32> to vector<16x128xf32>
    %cst_13 = arith.constant dense<0.000000e+00> : vector<64x128xf32>
    %13 = tpu.matmul %10, %12, %cst_13 {dimension_numbers = #tpu.dot_dimension_numbers<[1], [0], [0], [1], [0, 0, 1, 1], [], []>} : vector<64x16xf32>, vector<16x128xf32>, vector<64x128xf32> -> vector<64x128xf32>
    %14 = arith.addf %7, %13 : vector<64x128xf32>
    %c0_14 = arith.constant 0 : index
    %c1_15 = arith.constant 1 : index
    %c0_16 = arith.constant 0 : index
    %c0_17 = arith.constant 0 : index
    %15 = vector.load %arg1[%c0_14, %c1_15, %c0_16, %c0_17] : memref<1x9x9x16xf32, #tpu.memory_space<vmem>>, vector<1x8x8x16xf32>
    %16 = vector.shape_cast %15 : vector<1x8x8x16xf32> to vector<8x8x16xf32>
    %17 = vector.shape_cast %16 : vector<8x8x16xf32> to vector<64x16xf32>
    %c2 = arith.constant 2 : index
    %c0_18 = arith.constant 0 : index
    %c0_19 = arith.constant 0 : index
    %18 = vector.load %arg2[%c2, %c0_18, %c0_19] : memref<4x16x128xf32, #tpu.memory_space<vmem>>, vector<1x16x128xf32>
    %19 = vector.shape_cast %18 : vector<1x16x128xf32> to vector<16x128xf32>
    %cst_20 = arith.constant dense<0.000000e+00> : vector<64x128xf32>
    %20 = tpu.matmul %17, %19, %cst_20 {dimension_numbers = #tpu.dot_dimension_numbers<[1], [0], [0], [1], [0, 0, 1, 1], [], []>} : vector<64x16xf32>, vector<16x128xf32>, vector<64x128xf32> -> vector<64x128xf32>
    %21 = arith.addf %14, %20 : vector<64x128xf32>
    %c0_21 = arith.constant 0 : index
    %c1_22 = arith.constant 1 : index
    %c1_23 = arith.constant 1 : index
    %c0_24 = arith.constant 0 : index
    %22 = vector.load %arg1[%c0_21, %c1_22, %c1_23, %c0_24] : memref<1x9x9x16xf32, #tpu.memory_space<vmem>>, vector<1x8x8x16xf32>
    %23 = vector.shape_cast %22 : vector<1x8x8x16xf32> to vector<8x8x16xf32>
    %24 = vector.shape_cast %23 : vector<8x8x16xf32> to vector<64x16xf32>
    %c3 = arith.constant 3 : index
    %c0_25 = arith.constant 0 : index
    %c0_26 = arith.constant 0 : index
    %25 = vector.load %arg2[%c3, %c0_25, %c0_26] : memref<4x16x128xf32, #tpu.memory_space<vmem>>, vector<1x16x128xf32>
    %26 = vector.shape_cast %25 : vector<1x16x128xf32> to vector<16x128xf32>
    %cst_27 = arith.constant dense<0.000000e+00> : vector<64x128xf32>
    %27 = tpu.matmul %24, %26, %cst_27 {dimension_numbers = #tpu.dot_dimension_numbers<[1], [0], [0], [1], [0, 0, 1, 1], [], []>} : vector<64x16xf32>, vector<16x128xf32>, vector<64x128xf32> -> vector<64x128xf32>
    %28 = arith.addf %21, %27 : vector<64x128xf32>
    %c0_28 = arith.constant 0 : index
    %c0_29 = arith.constant 0 : index
    %29 = vector.load %arg3[%c0_28, %c0_29] : memref<1x128xf32, #tpu.memory_space<vmem>>, vector<1x128xf32>
    %30 = vector.broadcast %29 : vector<1x128xf32> to vector<64x128xf32>
    %31 = arith.addf %28, %30 : vector<64x128xf32>
    %c0_30 = arith.constant 0 : index
    %c0_31 = arith.constant 0 : index
    %32 = vector.load %arg4[%c0_30, %c0_31] : memref<1x128xf32, #tpu.memory_space<vmem>>, vector<1x128xf32>
    %33 = vector.broadcast %32 : vector<1x128xf32> to vector<64x128xf32>
    %34 = arith.mulf %31, %33 : vector<64x128xf32>
    %c0_32 = arith.constant 0 : index
    %c0_33 = arith.constant 0 : index
    %35 = vector.load %arg5[%c0_32, %c0_33] : memref<1x128xf32, #tpu.memory_space<vmem>>, vector<1x128xf32>
    %36 = vector.broadcast %35 : vector<1x128xf32> to vector<64x128xf32>
    %37 = arith.addf %34, %36 : vector<64x128xf32>
    %cst_34 = arith.constant 0.000000e+00 : f32
    %38 = vector.broadcast %cst_34 : f32 to vector<64x128xf32>
    %39 = arith.maximumf %37, %38 : vector<64x128xf32>
    %cst_35 = arith.constant 0.000000e+00 : f32
    %40 = vector.broadcast %cst_35 : f32 to vector<10x10x128xf32>
    %c0_36 = arith.constant 0 : index
    %c0_37 = arith.constant 0 : index
    %c0_38 = arith.constant 0 : index
    %41 = vector.load %arg9[%c0_36, %c0_37, %c0_38] : memref<10x10x128xf32, #tpu.memory_space<vmem>>, vector<10x10x128xf32>
    tpu.vector_store %arg9[%c0_36, %c0_37, %c0_38], %40 {strides = array<i32>} : memref<10x10x128xf32, #tpu.memory_space<vmem>>, vector<10x10x128xf32>,
    %42 = vector.shape_cast %39 : vector<64x128xf32> to vector<8x8x128xf32>
    %c1_39 = arith.constant 1 : index
    %c1_40 = arith.constant 1 : index
    %c0_41 = arith.constant 0 : index
    %43 = vector.load %arg9[%c1_39, %c1_40, %c0_41] : memref<10x10x128xf32, #tpu.memory_space<vmem>>, vector<8x8x128xf32>
    tpu.vector_store %arg9[%c1_39, %c1_40, %c0_41], %42 {strides = array<i32>} : memref<10x10x128xf32, #tpu.memory_space<vmem>>, vector<8x8x128xf32>,
    %cst_42 = arith.constant 0.000000e+00 : f32
    %44 = vector.broadcast %cst_42 : f32 to vector<64x128xf32>
    %c0_43 = arith.constant 0 : index
    %c0_44 = arith.constant 0 : index
    %c0_45 = arith.constant 0 : index
    %45 = vector.load %arg9[%c0_43, %c0_44, %c0_45] : memref<10x10x128xf32, #tpu.memory_space<vmem>>, vector<8x8x128xf32>
    %46 = vector.shape_cast %45 : vector<8x8x128xf32> to vector<64x128xf32>
    %c0_46 = arith.constant 0 : index
    %c0_47 = arith.constant 0 : index
    %c0_48 = arith.constant 0 : index
    %47 = vector.load %arg6[%c0_46, %c0_47, %c0_48] : memref<9x128x128xf32, #tpu.memory_space<vmem>>, vector<1x128x128xf32>
    %48 = vector.shape_cast %47 : vector<1x128x128xf32> to vector<128x128xf32>
    %cst_49 = arith.constant dense<0.000000e+00> : vector<64x128xf32>
    %49 = tpu.matmul %46, %48, %cst_49 {dimension_numbers = #tpu.dot_dimension_numbers<[1], [0], [0], [1], [0, 0, 1, 1], [], []>} : vector<64x128xf32>, vector<128x128xf32>, vector<64x128xf32> -> vector<64x128xf32>
    %50 = arith.addf %44, %49 : vector<64x128xf32>
    %c0_50 = arith.constant 0 : index
    %c1_51 = arith.constant 1 : index
    %c0_52 = arith.constant 0 : index
    %51 = vector.load %arg9[%c0_50, %c1_51, %c0_52] : memref<10x10x128xf32, #tpu.memory_space<vmem>>, vector<8x8x128xf32>
    %52 = vector.shape_cast %51 : vector<8x8x128xf32> to vector<64x128xf32>
    %c1_53 = arith.constant 1 : index
    %c0_54 = arith.constant 0 : index
    %c0_55 = arith.constant 0 : index
    %53 = vector.load %arg6[%c1_53, %c0_54, %c0_55] : memref<9x128x128xf32, #tpu.memory_space<vmem>>, vector<1x128x128xf32>
    %54 = vector.shape_cast %53 : vector<1x128x128xf32> to vector<128x128xf32>
    %cst_56 = arith.constant dense<0.000000e+00> : vector<64x128xf32>
    %55 = tpu.matmul %52, %54, %cst_56 {dimension_numbers = #tpu.dot_dimension_numbers<[1], [0], [0], [1], [0, 0, 1, 1], [], []>} : vector<64x128xf32>, vector<128x128xf32>, vector<64x128xf32> -> vector<64x128xf32>
    %56 = arith.addf %50, %55 : vector<64x128xf32>
    %c0_57 = arith.constant 0 : index
    %c2_58 = arith.constant 2 : index
    %c0_59 = arith.constant 0 : index
    %57 = vector.load %arg9[%c0_57, %c2_58, %c0_59] : memref<10x10x128xf32, #tpu.memory_space<vmem>>, vector<8x8x128xf32>
    %58 = vector.shape_cast %57 : vector<8x8x128xf32> to vector<64x128xf32>
    %c2_60 = arith.constant 2 : index
    %c0_61 = arith.constant 0 : index
    %c0_62 = arith.constant 0 : index
    %59 = vector.load %arg6[%c2_60, %c0_61, %c0_62] : memref<9x128x128xf32, #tpu.memory_space<vmem>>, vector<1x128x128xf32>
    %60 = vector.shape_cast %59 : vector<1x128x128xf32> to vector<128x128xf32>
    %cst_63 = arith.constant dense<0.000000e+00> : vector<64x128xf32>
    %61 = tpu.matmul %58, %60, %cst_63 {dimension_numbers = #tpu.dot_dimension_numbers<[1], [0], [0], [1], [0, 0, 1, 1], [], []>} : vector<64x128xf32>, vector<128x128xf32>, vector<64x128xf32> -> vector<64x128xf32>
    %62 = arith.addf %56, %61 : vector<64x128xf32>
    %c1_64 = arith.constant 1 : index
    %c0_65 = arith.constant 0 : index
    %c0_66 = arith.constant 0 : index
    %63 = vector.load %arg9[%c1_64, %c0_65, %c0_66] : memref<10x10x128xf32, #tpu.memory_space<vmem>>, vector<8x8x128xf32>
    %64 = vector.shape_cast %63 : vector<8x8x128xf32> to vector<64x128xf32>
    %c3_67 = arith.constant 3 : index
    %c0_68 = arith.constant 0 : index
    %c0_69 = arith.constant 0 : index
    %65 = vector.load %arg6[%c3_67, %c0_68, %c0_69] : memref<9x128x128xf32, #tpu.memory_space<vmem>>, vector<1x128x128xf32>
    %66 = vector.shape_cast %65 : vector<1x128x128xf32> to vector<128x128xf32>
    %cst_70 = arith.constant dense<0.000000e+00> : vector<64x128xf32>
    %67 = tpu.matmul %64, %66, %cst_70 {dimension_numbers = #tpu.dot_dimension_numbers<[1], [0], [0], [1], [0, 0, 1, 1], [], []>} : vector<64x128xf32>, vector<128x128xf32>, vector<64x128xf32> -> vector<64x128xf32>
    %68 = arith.addf %62, %67 : vector<64x128xf32>
    %c1_71 = arith.constant 1 : index
    %c1_72 = arith.constant 1 : index
    %c0_73 = arith.constant 0 : index
    %69 = vector.load %arg9[%c1_71, %c1_72, %c0_73] : memref<10x10x128xf32, #tpu.memory_space<vmem>>, vector<8x8x128xf32>
    %70 = vector.shape_cast %69 : vector<8x8x128xf32> to vector<64x128xf32>
    %c4 = arith.constant 4 : index
    %c0_74 = arith.constant 0 : index
    %c0_75 = arith.constant 0 : index
    %71 = vector.load %arg6[%c4, %c0_74, %c0_75] : memref<9x128x128xf32, #tpu.memory_space<vmem>>, vector<1x128x128xf32>
    %72 = vector.shape_cast %71 : vector<1x128x128xf32> to vector<128x128xf32>
    %cst_76 = arith.constant dense<0.000000e+00> : vector<64x128xf32>
    %73 = tpu.matmul %70, %72, %cst_76 {dimension_numbers = #tpu.dot_dimension_numbers<[1], [0], [0], [1], [0, 0, 1, 1], [], []>} : vector<64x128xf32>, vector<128x128xf32>, vector<64x128xf32> -> vector<64x128xf32>
    %74 = arith.addf %68, %73 : vector<64x128xf32>
    %c1_77 = arith.constant 1 : index
    %c2_78 = arith.constant 2 : index
    %c0_79 = arith.constant 0 : index
    %75 = vector.load %arg9[%c1_77, %c2_78, %c0_79] : memref<10x10x128xf32, #tpu.memory_space<vmem>>, vector<8x8x128xf32>
    %76 = vector.shape_cast %75 : vector<8x8x128xf32> to vector<64x128xf32>
    %c5 = arith.constant 5 : index
    %c0_80 = arith.constant 0 : index
    %c0_81 = arith.constant 0 : index
    %77 = vector.load %arg6[%c5, %c0_80, %c0_81] : memref<9x128x128xf32, #tpu.memory_space<vmem>>, vector<1x128x128xf32>
    %78 = vector.shape_cast %77 : vector<1x128x128xf32> to vector<128x128xf32>
    %cst_82 = arith.constant dense<0.000000e+00> : vector<64x128xf32>
    %79 = tpu.matmul %76, %78, %cst_82 {dimension_numbers = #tpu.dot_dimension_numbers<[1], [0], [0], [1], [0, 0, 1, 1], [], []>} : vector<64x128xf32>, vector<128x128xf32>, vector<64x128xf32> -> vector<64x128xf32>
    %80 = arith.addf %74, %79 : vector<64x128xf32>
    %c2_83 = arith.constant 2 : index
    %c0_84 = arith.constant 0 : index
    %c0_85 = arith.constant 0 : index
    %81 = vector.load %arg9[%c2_83, %c0_84, %c0_85] : memref<10x10x128xf32, #tpu.memory_space<vmem>>, vector<8x8x128xf32>
    %82 = vector.shape_cast %81 : vector<8x8x128xf32> to vector<64x128xf32>
    %c6 = arith.constant 6 : index
    %c0_86 = arith.constant 0 : index
    %c0_87 = arith.constant 0 : index
    %83 = vector.load %arg6[%c6, %c0_86, %c0_87] : memref<9x128x128xf32, #tpu.memory_space<vmem>>, vector<1x128x128xf32>
    %84 = vector.shape_cast %83 : vector<1x128x128xf32> to vector<128x128xf32>
    %cst_88 = arith.constant dense<0.000000e+00> : vector<64x128xf32>
    %85 = tpu.matmul %82, %84, %cst_88 {dimension_numbers = #tpu.dot_dimension_numbers<[1], [0], [0], [1], [0, 0, 1, 1], [], []>} : vector<64x128xf32>, vector<128x128xf32>, vector<64x128xf32> -> vector<64x128xf32>
    %86 = arith.addf %80, %85 : vector<64x128xf32>
    %c2_89 = arith.constant 2 : index
    %c1_90 = arith.constant 1 : index
    %c0_91 = arith.constant 0 : index
    %87 = vector.load %arg9[%c2_89, %c1_90, %c0_91] : memref<10x10x128xf32, #tpu.memory_space<vmem>>, vector<8x8x128xf32>
    %88 = vector.shape_cast %87 : vector<8x8x128xf32> to vector<64x128xf32>
    %c7 = arith.constant 7 : index
    %c0_92 = arith.constant 0 : index
    %c0_93 = arith.constant 0 : index
    %89 = vector.load %arg6[%c7, %c0_92, %c0_93] : memref<9x128x128xf32, #tpu.memory_space<vmem>>, vector<1x128x128xf32>
    %90 = vector.shape_cast %89 : vector<1x128x128xf32> to vector<128x128xf32>
    %cst_94 = arith.constant dense<0.000000e+00> : vector<64x128xf32>
    %91 = tpu.matmul %88, %90, %cst_94 {dimension_numbers = #tpu.dot_dimension_numbers<[1], [0], [0], [1], [0, 0, 1, 1], [], []>} : vector<64x128xf32>, vector<128x128xf32>, vector<64x128xf32> -> vector<64x128xf32>
    %92 = arith.addf %86, %91 : vector<64x128xf32>
    %c2_95 = arith.constant 2 : index
    %c2_96 = arith.constant 2 : index
    %c0_97 = arith.constant 0 : index
    %93 = vector.load %arg9[%c2_95, %c2_96, %c0_97] : memref<10x10x128xf32, #tpu.memory_space<vmem>>, vector<8x8x128xf32>
    %94 = vector.shape_cast %93 : vector<8x8x128xf32> to vector<64x128xf32>
    %c8 = arith.constant 8 : index
    %c0_98 = arith.constant 0 : index
    %c0_99 = arith.constant 0 : index
    %95 = vector.load %arg6[%c8, %c0_98, %c0_99] : memref<9x128x128xf32, #tpu.memory_space<vmem>>, vector<1x128x128xf32>
    %96 = vector.shape_cast %95 : vector<1x128x128xf32> to vector<128x128xf32>
    %cst_100 = arith.constant dense<0.000000e+00> : vector<64x128xf32>
    %97 = tpu.matmul %94, %96, %cst_100 {dimension_numbers = #tpu.dot_dimension_numbers<[1], [0], [0], [1], [0, 0, 1, 1], [], []>} : vector<64x128xf32>, vector<128x128xf32>, vector<64x128xf32> -> vector<64x128xf32>
    %98 = arith.addf %92, %97 : vector<64x128xf32>
    %c0_101 = arith.constant 0 : index
    %c0_102 = arith.constant 0 : index
    %99 = vector.load %arg7[%c0_101, %c0_102] : memref<1x128xf32, #tpu.memory_space<vmem>>, vector<1x128xf32>
    %100 = vector.broadcast %99 : vector<1x128xf32> to vector<64x128xf32>
    %101 = arith.addf %98, %100 : vector<64x128xf32>
    %cst_103 = arith.constant 0.000000e+00 : f32
    %102 = vector.broadcast %cst_103 : f32 to vector<64x128xf32>
    %103 = arith.maximumf %101, %102 : vector<64x128xf32>
    %c0_104 = arith.constant 0 : index
    %c0_105 = arith.constant 0 : index
    %c0_106 = arith.constant 0 : index
    %104 = vector.load %arg8[%c0_104, %c0_105, %c0_106] : memref<1x64x128xf32, #tpu.memory_space<vmem>>, vector<1x64x128xf32>
    %105 = vector.shape_cast %104 : vector<1x64x128xf32> to vector<64x128xf32>
    %106 = vector.shape_cast %103 : vector<64x128xf32> to vector<1x64x128xf32>
    tpu.vector_store %arg8[%c0_104, %c0_105, %c0_106], %106 {strides = array<i32>} : memref<1x64x128xf32, #tpu.memory_space<vmem>>, vector<1x64x128xf32>,
    return
  }
  func.func @transform_0(%arg0: i32) -> (i32, i32, i32, i32) {
    %c0_i32 = arith.constant 0 : i32
    %c0_i32_0 = arith.constant 0 : i32
    %c0_i32_1 = arith.constant 0 : i32
    %c0_i32_2 = arith.constant 0 : i32
    return %arg0, %c0_i32, %c0_i32_0, %c0_i32_1 : i32, i32, i32, i32
  }
  func.func @transform_1(%arg0: i32) -> (i32, i32, i32) {
    %c0_i32 = arith.constant 0 : i32
    %c0_i32_0 = arith.constant 0 : i32
    %c0_i32_1 = arith.constant 0 : i32
    %c0_i32_2 = arith.constant 0 : i32
    return %c0_i32, %c0_i32_0, %c0_i32_1 : i32, i32, i32
  }
  func.func @transform_2(%arg0: i32) -> (i32, i32) {
    %c0_i32 = arith.constant 0 : i32
    %c0_i32_0 = arith.constant 0 : i32
    %c0_i32_1 = arith.constant 0 : i32
    return %c0_i32, %c0_i32_0 : i32, i32
  }
  func.func @transform_3(%arg0: i32) -> (i32, i32) {
    %c0_i32 = arith.constant 0 : i32
    %c0_i32_0 = arith.constant 0 : i32
    %c0_i32_1 = arith.constant 0 : i32
    return %c0_i32, %c0_i32_0 : i32, i32
  }
  func.func @transform_4(%arg0: i32) -> (i32, i32) {
    %c0_i32 = arith.constant 0 : i32
    %c0_i32_0 = arith.constant 0 : i32
    %c0_i32_1 = arith.constant 0 : i32
    return %c0_i32, %c0_i32_0 : i32, i32
  }
  func.func @transform_5(%arg0: i32) -> (i32, i32, i32) {
    %c0_i32 = arith.constant 0 : i32
    %c0_i32_0 = arith.constant 0 : i32
    %c0_i32_1 = arith.constant 0 : i32
    %c0_i32_2 = arith.constant 0 : i32
    return %c0_i32, %c0_i32_0, %c0_i32_1 : i32, i32, i32
  }
  func.func @transform_6(%arg0: i32) -> (i32, i32) {
    %c0_i32 = arith.constant 0 : i32
    %c0_i32_0 = arith.constant 0 : i32
    %c0_i32_1 = arith.constant 0 : i32
    return %c0_i32, %c0_i32_0 : i32, i32
  }
  func.func @transform_7(%arg0: i32) -> (i32, i32, i32) {
    %c0_i32 = arith.constant 0 : i32
    %c0_i32_0 = arith.constant 0 : i32
    %c0_i32_1 = arith.constant 0 : i32
    return %arg0, %c0_i32, %c0_i32_0 : i32, i32, i32
  }
}

</mosaic_0001>

<bundles_post_ra>
// kernel: downsample_x2.2
= control target key start
LH: loop header
LB: loop body
LE: loop exit
PB: predicated region body
PF: predicated region fallthrough
CT: control target
= control target key end

     0   :  { %s1066_s12 = smov 0   ;;  %s1173_s0 = inlined_call_operand.vmem [shape: f32[2,9,9,16], index: 0, kind: input, shape index: {}]   ;;  %s1174_s1 = inlined_call_operand.vmem [shape: f32[4,16,128], index: 1, kind: input, shape index: {}]   ;;  %s1175_s2 = inlined_call_operand.vmem [shape: f32[1,128], index: 2, kind: input, shape index: {}]   ;;  %s1176_s3 = inlined_call_operand.vmem [shape: f32[2,128], index: 3, kind: output, shape index: {}]  }
   0x1 LB: > { %s1072_s13 = sadd.s32 4294967295, %s1043_s12   ;;  %p823_p0 = scmp.ge.s32.totalorder %s1043_s12, 1  ;;  %s1043_s12 = sphi %s1066_s12, %s13_s12  }
   0x2   : > { %p132_p1 = scmp.lt.s32.totalorder %s1043_s12, 3 }
   0x4   : > { %p133_p2 = pnand %p823_p0, %p132_p1 }
   0x5   : > { %v825_v0 = vld [vmem:[%s1174_s1 + $0x10] sm:$0xff] (!%p133_p2)  ;;  %v826_v1 = vld [vmem:[%s1174_s1 + $0x18] sm:$0xff] (!%p133_p2)  ;;  %v851_v2 = vld [vmem:[%s1174_s1 + $0x20] sm:$0xff] (!%p133_p2)  ;;  %p151_p3 = scmp.lt.s32.totalorder (!%p133_p2), %s1072_s13, 1  ;;  %vm177_vm0 = vcmask (!%p133_p2), 130048   ;;  %vm782_vm1 = vcmask (!%p133_p2), 1040384  }
   0x6   : > { %136 = sbr.rel (%p133_p2) target bundleno = 288 (0x120), region = 32  ;;  %v987_v3 = vpack.c.bf16 (!%p133_p2), %v826_v1, %v825_v0  ;;  %v852_v4 = vld [vmem:[%s1174_s1 + $0x28] sm:$0xff] (!%p133_p2)  ;;  %v164_v5 = vld [vmem:[%s1174_s1] sm:$0xff] (!%p133_p2)  ;;  %v869_v9 = vld [vmem:[%s1174_s1 + $0x30] sm:$0xff] (!%p133_p2)  ;;  %p880_p4 = scmp.ne.s32.totalorder (!%p133_p2), %s1072_s13, 0 }
   0x7   : > { %v165_v6 = vld [vmem:[%s1174_s1 + $0x8] sm:$0xff] (!%p133_p2)  ;;  %v995_v7 = vpack.c.bf16 (!%p133_p2), %v852_v4, %v851_v2  ;;  %v870_v10 = vld [vmem:[%s1174_s1 + $0x38] sm:$0xff] (!%p133_p2)  ;;  %v879_v32 = vld [vmem:[%s1175_s2] ss:$0 sm:$0xff] (!%p133_p2) }
   0x8   : > { %v991_v8 = vpack.c.bf16 (!%p133_p2), %v165_v6, %v164_v5  ;;  %988 = vmatprep.subr.bf16.mxu1 (!%p133_p2), %v987_v3  ;;  %v999_v11 = vpack.c.bf16 (!%p133_p2), %v870_v10, %v869_v9 }
   0x9   : > { %996 = vmatprep.subr.bf16.mxu0 (!%p133_p2), %v995_v7  ;;  %990 = vmatpush3.bf16.msra.mxu1 (!%p133_p2), %v987_v3 }
   0xa   : > { %998 = vmatpush3.bf16.msra.mxu0 (!%p133_p2), %v995_v7  ;;  %992 = vmatprep.subr.bf16.mxu1 (!%p133_p2), %v991_v8 }
   0xb   : > { %1000 = vmatprep.subr.bf16.mxu0 (!%p133_p2), %v999_v11 }
   0xd   : > { %s152_s26 = scalar_select %p151_p3, %s1072_s13, 1 }
   0xf   : > { %s1027_s4 = smul.u32 144, %s152_s26 }
  0x11   : > { %s1105_s7 = scalar_lea.vmem %s1173_s0, %s1027_s4 }
  0x12   : > { %v166_v12 = vld [vmem:[%s1105_s7 + $0x1] sm:$0xff]  ;;  %v843_v13 = vld [vmem:[%s1105_s7 + $0x10] sm:$0xff] }
  0x13   : > { %v167_v14 = vld [vmem:[%s1105_s7 + $0x11] sm:$0xff]  ;;  %927 = vmatprep.mubr.msk.f32.mxu1 %vm177_vm0, %v166_v12  ;;  %959 = vmatprep.mubr.msk.f32.mxu0 %vm177_vm0, %v843_v13  ;;  %v844_v15 = vld [vmem:[%s1105_s7 + $0x20] sm:$0xff] }
  0x14   : > { %v168_v16 = vld [vmem:[%s1105_s7 + $0x21] sm:$0xff]  ;;  %v845_v17 = vld [vmem:[%s1105_s7 + $0x30] sm:$0xff]  ;;  %928 = vmatmul.mubr.msk.f32.vlgmr.msra.gmra.mrb[0].mxu1 %vm177_vm0, %v167_v14  ;;  %960 = vmatmul.mubr.msk.f32.vlgmr.msra.gmra.mrb[0].mxu0 %vm177_vm0, %v844_v15 }
  0x15   : > { %994 = vmatpush3.bf16.msra.mxu1 %v991_v8  ;;  %1002 = vmatpush3.bf16.msra.mxu0 %v999_v11  ;;  %v169_v18 = vld [vmem:[%s1105_s7 + $0x31] sm:$0xff]  ;;  %v846_v19 = vld [vmem:[%s1105_s7 + $0x40] sm:$0xff] }
  0x16   : > { %930 = vmatprep.mubr.msk.f32.mxu1 %vm177_vm0, %v168_v16  ;;  %962 = vmatprep.mubr.msk.f32.mxu0 %vm177_vm0, %v845_v17  ;;  %v170_v20 = vld [vmem:[%s1105_s7 + $0x41] sm:$0xff]  ;;  %v847_v21 = vld [vmem:[%s1105_s7 + $0x50] sm:$0xff] }
  0x17   : > { %v171_v22 = vld [vmem:[%s1105_s7 + $0x51] sm:$0xff]  ;;  %v848_v23 = vld [vmem:[%s1105_s7 + $0x60] sm:$0xff] }
  0x18   : > { %931 = vmatmul.mubr.msk.f32.gmra.mrb[2].mxu1 %vm177_vm0, %v169_v18  ;;  %963 = vmatmul.mubr.msk.f32.gmra.mrb[2].mxu0 %vm177_vm0, %v846_v19  ;;  %v172_v24 = vld [vmem:[%s1105_s7 + $0x61] sm:$0xff]  ;;  %v849_v25 = vld [vmem:[%s1105_s7 + $0x70] sm:$0xff] }
  0x19   : > { %933 = vmatprep.mubr.msk.f32.mxu1 %vm177_vm0, %v170_v20  ;;  %965 = vmatprep.mubr.msk.f32.mxu0 %vm177_vm0, %v847_v21  ;;  %v173_v26 = vld [vmem:[%s1105_s7 + $0x71] sm:$0xff]  ;;  %v850_v27 = vld [vmem:[%s1105_s7 + $0x80] sm:$0xff] }
  0x1a   : > { %v156_v28 = vld [vmem:[%s1105_s7] sm:$0xff] }
  0x1b   : > { %v868_v29 = vld [vmem:[%s1105_s7 + $0x81] sm:$0xff] }
  0x1c   : > { %934 = vmatmul.mubr.msk.f32.gmra.mrb[4].mxu1 %vm177_vm0, %v171_v22  ;;  %966 = vmatmul.mubr.msk.f32.gmra.mrb[4].mxu0 %vm177_vm0, %v848_v23 }
  0x1d   : > { %936 = vmatprep.mubr.msk.f32.mxu1 %vm177_vm0, %v172_v24  ;;  %968 = vmatprep.mubr.msk.f32.mxu0 %vm177_vm0, %v849_v25 }
  0x20   : > { %937 = vmatmul.mubr.msk.f32.gmra.mrb[6].mxu1 %vm177_vm0, %v173_v26  ;;  %969 = vmatmul.mubr.msk.f32.gmra.mrb[6].mxu0 %vm177_vm0, %v850_v27 }
  0x21   : > { %943 = vmatprep.mubr.msk.f32.mxu1 %vm177_vm0, %v156_v28  ;;  %975 = vmatprep.mubr.msk.f32.mxu0 %vm177_vm0, %v167_v14 }
  0x24   : > { %944 = vmatmul.mubr.msk.f32.vlgmr.msra.gmra.mrb[0].mxu1 %vm177_vm0, %v843_v13  ;;  %976 = vmatmul.mubr.msk.f32.vlgmr.msra.gmra.mrb[0].mxu0 %vm177_vm0, %v168_v16 }
  0x25   : > { %946 = vmatprep.mubr.msk.f32.mxu1 %vm177_vm0, %v844_v15  ;;  %978 = vmatprep.mubr.msk.f32.mxu0 %vm177_vm0, %v169_v18 }
  0x28   : > { %947 = vmatmul.mubr.msk.f32.gmra.mrb[2].mxu1 %vm177_vm0, %v845_v17  ;;  %979 = vmatmul.mubr.msk.f32.gmra.mrb[2].mxu0 %vm177_vm0, %v170_v20 }
  0x29   : > { %949 = vmatprep.mubr.msk.f32.mxu1 %vm177_vm0, %v846_v19  ;;  %981 = vmatprep.mubr.msk.f32.mxu0 %vm177_vm0, %v171_v22 }
  0x2c   : > { %950 = vmatmul.mubr.msk.f32.gmra.mrb[4].mxu1 %vm177_vm0, %v847_v21  ;;  %982 = vmatmul.mubr.msk.f32.gmra.mrb[4].mxu0 %vm177_vm0, %v172_v24 }
  0x2d   : > { %952 = vmatprep.mubr.msk.f32.mxu1 %vm177_vm0, %v848_v23  ;;  %984 = vmatprep.mubr.msk.f32.mxu0 %vm177_vm0, %v173_v26 }
  0x30   : > { %953 = vmatmul.mubr.msk.f32.gmra.mrb[6].mxu1 %vm177_vm0, %v849_v25  ;;  %985 = vmatmul.mubr.msk.f32.gmra.mrb[6].mxu0 %vm177_vm0, %v868_v29 }
  0xf7   : > { %v945_v30 = vpop.f32.mrb[0].mxu1  ;;  %v977_v31 = vpop.f32.mrb[0].mxu0 }
  0xf8   : > { %v1003_v33 = vadd.f32 %v977_v31, %v945_v30  ;;  %v397_v34 = vpop.f32.mrb[1].mxu1  ;;  %v686_v35 = vpop.f32.mrb[1].mxu0 }
  0xf9   : > { %v1004_v36 = vadd.f32 %v686_v35, %v397_v34  ;;  %v1045_v34 = vmov (!%p880_p4), 0.0  }
  0xfa   : > { %v741_v37 = vadd.f32 %v1003_v33, %v879_v32  ;;  %788 = vst [vmem:[%s1176_s3] sm:$0x3] (!%p880_p4), %v1045_v34 }
  0xfb   : > { %v740_v38 = vadd.f32 %v1004_v36, %v879_v32  ;;  %v948_v39 = vpop.f32.mrb[2].mxu1  ;;  %v980_v40 = vpop.f32.mrb[2].mxu0 }
  0xfc   : > { %v762_v41 = vmul.f32 %v741_v37, %v741_v37  ;;  %v1005_v42 = vadd.f32 %v980_v40, %v948_v39  ;;  %v407_v43 = vpop.f32.mrb[3].mxu1  ;;  %v696_v44 = vpop.f32.mrb[3].mxu0 }
  0xfd   : > { %v748_v45 = vadd.f32 %v741_v37, %v740_v38  ;;  %v761_v46 = vmul.f32 %v740_v38, %v740_v38  ;;  %v1006_v47 = vadd.f32 %v696_v44, %v407_v43 }
  0xfe   : > { %v743_v49 = vadd.f32 %v1005_v42, %v879_v32 }
  0xff   : > { %v769_v48 = vadd.f32 %v762_v41, %v761_v46  ;;  %v742_v50 = vadd.f32 %v1006_v47, %v879_v32  ;;  %v951_v51 = vpop.f32.mrb[4].mxu1  ;;  %v983_v52 = vpop.f32.mrb[4].mxu0 }
 0x100   : > { %v1007_v53 = vadd.f32 %v983_v52, %v951_v51  ;;  %v417_v54 = vpop.f32.mrb[5].mxu1  ;;  %v706_v55 = vpop.f32.mrb[5].mxu0  ;;  %v764_v60 = vmul.f32 %v743_v49, %v743_v49 }
 0x101   : > { %v749_v56 = vadd.f32 %v748_v45, %v742_v50  ;;  %v763_v57 = vmul.f32 %v742_v50, %v742_v50  ;;  %v1008_v58 = vadd.f32 %v706_v55, %v417_v54 }
 0x102   : > { %v745_v59 = vadd.f32 %v1007_v53, %v879_v32 }
 0x103   : > { %v770_v61 = vadd.f32 %v769_v48, %v763_v57  ;;  %v744_v62 = vadd.f32 %v1008_v58, %v879_v32  ;;  %v750_v63 = vadd.f32 %v749_v56, %v743_v49  ;;  %v954_v0 = vpop.f32.mrb[6].mxu1  ;;  %v986_v1 = vpop.f32.mrb[6].mxu0 }
 0x104   : > { %v1009_v2 = vadd.f32 %v986_v1, %v954_v0  ;;  %v427_v3 = vpop.f32.mrb[7].mxu1  ;;  %v716_v4 = vpop.f32.mrb[7].mxu0  ;;  %v766_v9 = vmul.f32 %v745_v59, %v745_v59 }
 0x105   : > { %v751_v5 = vadd.f32 %v750_v63, %v744_v62  ;;  %v765_v6 = vmul.f32 %v744_v62, %v744_v62  ;;  %v771_v7 = vadd.f32 %v770_v61, %v764_v60  ;;  %v1010_v8 = vadd.f32 %v716_v4, %v427_v3 }
 0x106   : > { %v747_v11 = vadd.f32 %v1009_v2, %v879_v32 }
 0x107   : > { %v772_v10 = vadd.f32 %v771_v7, %v765_v6  ;;  %v746_v12 = vadd.f32 %v1010_v8, %v879_v32  ;;  %v752_v13 = vadd.f32 %v751_v5, %v745_v59 }
 0x108   : > { %v768_v17 = vmul.f32 %v747_v11, %v747_v11 }
 0x109   : > { %v753_v14 = vadd.f32 %v752_v13, %v746_v12  ;;  %v767_v15 = vmul.f32 %v746_v12, %v746_v12  ;;  %v773_v16 = vadd.f32 %v772_v10, %v766_v9 }
 0x10b   : > { %v754_v18 = vadd.f32 %v753_v14, %v747_v11  ;;  %v774_v19 = vadd.f32 %v773_v16, %v767_v15 }
 0x10d   : > { %v755_v20 = vrot.slane %v754_v18, 4  ;;  %v775_v21 = vadd.f32 %v774_v19, %v768_v17 }
 0x10f   : > { %v756_v22 = vadd.f32 %v755_v20, %v754_v18  ;;  %v776_v23 = vrot.slane %v775_v21, 4 }
 0x111   : > { %v757_v24 = vrot.slane %v756_v22, 2  ;;  %v777_v25 = vadd.f32 %v776_v23, %v775_v21 }
 0x113   : > { %v758_v26 = vadd.f32 %v757_v24, %v756_v22  ;;  %v778_v27 = vrot.slane %v777_v25, 2 }
 0x115   : > { %v759_v28 = vrot.slane %v758_v26, 1  ;;  %v779_v29 = vadd.f32 %v778_v27, %v777_v25  ;;  %787 = sbr.rel (%p880_p4) target bundleno = 284 (0x11c), region = 36 }
 0x117   : > { %v780_v30 = vrot.slane %v779_v29, 1  ;;  %v760_v31 = vadd.f32 %v759_v28, %v758_v26 }
 0x119   : > { %v781_v32 = vadd.f32 %v780_v30, %v779_v29 }
 0x11b   : > { %v783_v33 = vsel %vm782_vm1, %v760_v31, %v781_v32 }
 0x11c PF: > { %v789_v35 = vld [vmem:[%s1176_s3] sm:$0x3] }
 0x11d   : > { %v790_v36 = vadd.f32 %v789_v35, %v783_v33 }
 0x11f   : > { %791 = vst [vmem:[%s1176_s3] sm:$0x3] %v790_v36 }
 0x120 PF: > { %s13_s12 = sadd.s32 1, %s1043_s12  }
 0x121   : > { %p10_p5 = scmp.ge.s32.totalorder %s13_s12, 4  }
 0x123   :  { %12 = sbr.rel (!%p10_p5) target bundleno = 1 (0x1), region = 66 }

// kernel: downsample_x2.3
= control target key start
LH: loop header
LB: loop body
LE: loop exit
PB: predicated region body
PF: predicated region fallthrough
CT: control target
= control target key end

     0   :  { %s3614_s24 = smov 0   ;;  %s4338_s0 = inlined_call_operand.vmem [shape: f32[2,9,9,16], index: 0, kind: input, shape index: {}]   ;;  %s4339_s1 = inlined_call_operand.vmem [shape: f32[4,16,128], index: 1, kind: input, shape index: {}]   ;;  %s4340_s2 = inlined_call_operand.vmem [shape: f32[1,128], index: 2, kind: input, shape index: {}]   ;;  %s4341_s3 = inlined_call_operand.vmem [shape: f32[1,128], index: 3, kind: input, shape index: {}]   ;;  %s4342_s4 = inlined_call_operand.vmem [shape: f32[1,128], index: 4, kind: input, shape index: {}]   ;;  %s4343_s5 = inlined_call_operand.vmem [shape: f32[9,128,128], index: 5, kind: input, shape index: {}]   ;;  %s4344_s6 = inlined_call_operand.vmem [shape: f32[1,128], index: 6, kind: input, shape index: {}]   ;;  %s4345_s7 = inlined_call_operand.vmem [shape: f32[2,64,128], index: 7, kind: output, shape index: {}]  }
   0x1 LB: > { %s2250_s25 = sadd.s32 4294967295, %s3571_s24   ;;  %p2254_p0 = scmp.ge.s32.totalorder %s3571_s24, 1  ;;  %s3571_s24 = sphi %s3614_s24, %s17_s24  }
   0x2   : > { %p237_p1 = scmp.lt.s32.totalorder %s3571_s24, 3 }
   0x4   : > { %p238_p2 = pnand %p2254_p0, %p237_p1 }
   0x5   : > { %v287_v0 = vld [vmem:[%s4339_s1] sm:$0xff] (!%p238_p2)  ;;  %v288_v1 = vld [vmem:[%s4339_s1 + $0x8] sm:$0xff] (!%p238_p2)  ;;  %p269_p3 = scmp.lt.s32.totalorder (!%p238_p2), %s2250_s25, 1  ;;  %v2258_v6 = vld [vmem:[%s4339_s1 + $0x10] sm:$0xff] (!%p238_p2)  ;;  %vm300_vm0 = vcmask (!%p238_p2), 130048  }
   0x6   : > { %241 = sbr.rel (%p238_p2) target bundleno = 636 (0x27c), region = 48  ;;  %v2284_v2 = vld [vmem:[%s4339_s1 + $0x20] sm:$0xff] (!%p238_p2)  ;;  %v3167_v3 = vpack.c.bf16 (!%p238_p2), %v288_v1, %v287_v0  ;;  %v2285_v4 = vld [vmem:[%s4339_s1 + $0x28] sm:$0xff] (!%p238_p2)  ;;  %v2259_v7 = vld [vmem:[%s4339_s1 + $0x18] sm:$0xff] (!%p238_p2) }
   0x7   : > { %v3171_v5 = vpack.c.bf16 (!%p238_p2), %v2285_v4, %v2284_v2  ;;  %v3163_v8 = vpack.c.bf16 (!%p238_p2), %v2259_v7, %v2258_v6  ;;  %v2363_v9 = vld [vmem:[%s4343_s5 + $0x200] sm:$0xff] (!%p238_p2)  ;;  %v2364_v10 = vld [vmem:[%s4343_s5 + $0x208] sm:$0xff] (!%p238_p2)  ;;  %v2302_v11 = vld [vmem:[%s4339_s1 + $0x30] sm:$0xff] (!%p238_p2) }
   0x8   : > { %3168 = vmatprep.subr.bf16.mxu0 (!%p238_p2), %v3167_v3  ;;  %v2303_v12 = vld [vmem:[%s4339_s1 + $0x38] sm:$0xff] (!%p238_p2)  ;;  %v3307_v13 = vpack.c.bf16 (!%p238_p2), %v2364_v10, %v2363_v9  ;;  %v2365_v18 = vld [vmem:[%s4343_s5 + $0x210] sm:$0xff] (!%p238_p2)  ;;  %v2367_v26 = vld [vmem:[%s4343_s5 + $0x220] sm:$0xff] (!%p238_p2) }
   0x9   : > { %3170 = vmatpush3.bf16.msra.mxu0 (!%p238_p2), %v3167_v3  ;;  %3164 = vmatprep.subr.bf16.mxu1 (!%p238_p2), %v3163_v8  ;;  %v3175_v17 = vpack.c.bf16 (!%p238_p2), %v2303_v12, %v2302_v11  ;;  %v2366_v19 = vld [vmem:[%s4343_s5 + $0x218] sm:$0xff] (!%p238_p2)  ;;  %v2368_v27 = vld [vmem:[%s4343_s5 + $0x228] sm:$0xff] (!%p238_p2)  ;;  %v2315_v36 = vld [vmem:[%s4343_s5 + $0x80] sm:$0xff] (!%p238_p2) }
   0xa   : > { %3172 = vmatprep.subr.bf16.mxu0 (!%p238_p2), %v3171_v5  ;;  %3166 = vmatpush3.bf16.msra.mxu1 (!%p238_p2), %v3163_v8  ;;  %v3311_v24 = vpack.c.bf16 (!%p238_p2), %v2366_v19, %v2365_v18  ;;  %v3315_v31 = vpack.c.bf16 (!%p238_p2), %v2368_v27, %v2367_v26  ;;  %v2316_v37 = vld [vmem:[%s4343_s5 + $0x88] sm:$0xff] (!%p238_p2)  ;;  %v2317_v41 = vld [vmem:[%s4343_s5 + $0x90] sm:$0xff] (!%p238_p2)  ;;  %v2318_v42 = vld [vmem:[%s4343_s5 + $0x98] sm:$0xff] (!%p238_p2)  ;;  %v3573_v8 = vmov (!%p238_p2), 0.0  }
   0xb   : > { %3308 = vmatprep.subr.bf16.mxu1 (!%p238_p2), %v3307_v13  ;;  %v3179_v39 = vpack.c.bf16 (!%p238_p2), %v2316_v37, %v2315_v36  ;;  %v3183_v43 = vpack.c.bf16 (!%p238_p2), %v2318_v42, %v2317_v41  ;;  %v2319_v44 = vld [vmem:[%s4343_s5 + $0xa0] sm:$0xff] (!%p238_p2)  ;;  %v2320_v45 = vld [vmem:[%s4343_s5 + $0xa8] sm:$0xff] (!%p238_p2)  ;;  %v2321_v48 = vld [vmem:[%s4343_s5 + $0xb0] sm:$0xff] (!%p238_p2)  ;;  %913 = vst [vmem:[#allocation2 + $0x20] sm:$0xff] (!%p238_p2), %v3573_v8 }
   0xc   : > { %v3187_v46 = vpack.c.bf16 (!%p238_p2), %v2320_v45, %v2319_v44  ;;  %v2322_v49 = vld [vmem:[%s4343_s5 + $0xb8] sm:$0xff] (!%p238_p2)  ;;  %v2369_v51 = vld [vmem:[%s4343_s5 + $0x230] sm:$0xff] (!%p238_p2)  ;;  %v2323_v54 = vld [vmem:[%s4343_s5 + $0xc0] sm:$0xff] (!%p238_p2)  ;;  %914 = vst [vmem:[#allocation2 + $0x28] sm:$0x3] (!%p238_p2), %v3573_v8 }
   0xd   : > { %s4347_s25 = smov (!%p269_p3, %s2250_s25), 1  ;;  %v3191_v50 = vpack.c.bf16 %v2322_v49, %v2321_v48  ;;  %v2370_v52 = vld [vmem:[%s4343_s5 + $0x238] sm:$0xff]  ;;  %v2324_v55 = vld [vmem:[%s4343_s5 + $0xc8] sm:$0xff]  ;;  %v2371_v57 = vld [vmem:[%s4343_s5 + $0x240] sm:$0xff]  ;;  %909 = vst [vmem:[#allocation2] sm:$0xff] %v3573_v8 }
   0xe   : > { %s3555_s19 = smul.u32 144, %s4347_s25  ;;  %v3319_v53 = vpack.c.bf16 %v2370_v52, %v2369_v51  ;;  %v3195_v56 = vpack.c.bf16 %v2324_v55, %v2323_v54  ;;  %v2372_v58 = vld [vmem:[%s4343_s5 + $0x248] sm:$0xff]  ;;  %v2325_v60 = vld [vmem:[%s4343_s5 + $0xd0] sm:$0xff]  ;;  %v2326_v61 = vld [vmem:[%s4343_s5 + $0xd8] sm:$0xff]  ;;  %910 = vst [vmem:[#allocation2 + $0x8] sm:$0x3] %v3573_v8 }
   0xf   : > { %v3323_v59 = vpack.c.bf16 %v2372_v58, %v2371_v57  ;;  %v3199_v62 = vpack.c.bf16 %v2326_v61, %v2325_v60  ;;  %v2373_v63 = vld [vmem:[%s4343_s5 + $0x250] sm:$0xff]  ;;  %v2374_v0 = vld [vmem:[%s4343_s5 + $0x258] sm:$0xff]  ;;  %v2327_v2 = vld [vmem:[%s4343_s5 + $0xe0] sm:$0xff]  ;;  %911 = vst [vmem:[#allocation2 + $0x10] sm:$0xff] %v3573_v8  ;;  %s2446_s27 = sshll.u32 %s4347_s25, 6 }
  0x10   : > { %s3658_s28 = scalar_lea.vmem %s4338_s0, %s3555_s19  ;;  %v3327_v1 = vpack.c.bf16 %v2374_v0, %v2373_v63  ;;  %v2328_v3 = vld [vmem:[%s4343_s5 + $0xe8] sm:$0xff]  ;;  %912 = vst [vmem:[#allocation2 + $0x18] sm:$0x3] %v3573_v8  ;;  %915 = vst [vmem:[#allocation2 + $0x30] sm:$0xff] %v3573_v8  ;;  %v2329_v9 = vld [vmem:[%s4343_s5 + $0xf0] sm:$0xff]  ;;  %s4325_s8 = scalar_lea.vmem %s4345_s7, %s2446_s27 }
  0x11   : > { %v279_v14 = vld [vmem:[%s3658_s28] sm:$0xff]  ;;  %v280_v15 = vld [vmem:[%s3658_s28 + $0x10] sm:$0xff]  ;;  %v3203_v4 = vpack.c.bf16 %v2328_v3, %v2327_v2  ;;  %v2376_v6 = vld [vmem:[%s4343_s5 + $0x268] sm:$0xff]  ;;  %916 = vst [vmem:[#allocation2 + $0x38] sm:$0x3] %v3573_v8 }
  0x12   : > { %v281_v16 = vld [vmem:[%s3658_s28 + $0x20] sm:$0xff]  ;;  %2723 = vmatprep.mubr.msk.f32.mxu0 %vm300_vm0, %v279_v14  ;;  %v282_v20 = vld [vmem:[%s3658_s28 + $0x30] sm:$0xff]  ;;  %917 = vst [vmem:[#allocation2 + $0x40] sm:$0xff] %v3573_v8  ;;  %918 = vst [vmem:[#allocation2 + $0x48] sm:$0x3] %v3573_v8 }
  0x13   : > { %2724 = vmatmul.mubr.msk.f32.vlgmr.msra.gmra.mrb[0].mxu0 %vm300_vm0, %v280_v15  ;;  %v289_v21 = vld [vmem:[%s3658_s28 + $0x1] sm:$0xff]  ;;  %v290_v22 = vld [vmem:[%s3658_s28 + $0x11] sm:$0xff]  ;;  %919 = vst [vmem:[#allocation2 + $0x50] sm:$0xff] %v3573_v8  ;;  %920 = vst [vmem:[#allocation2 + $0x58] sm:$0x3] %v3573_v8 }
  0x14   : > { %3174 = vmatpush3.bf16.msra.mxu0 %v3171_v5  ;;  %2726 = vmatprep.mubr.msk.f32.mxu0 %vm300_vm0, %v281_v16  ;;  %v283_v23 = vld [vmem:[%s3658_s28 + $0x40] sm:$0xff]  ;;  %v2296_v28 = vld [vmem:[%s3658_s28 + $0x31] sm:$0xff]  ;;  %921 = vst [vmem:[#allocation2 + $0x60] sm:$0xff] %v3573_v8  ;;  %922 = vst [vmem:[#allocation2 + $0x68] sm:$0x3] %v3573_v8 }
  0x15   : > { %3176 = vmatprep.subr.bf16.mxu0 %v3175_v17  ;;  %2707 = vmatprep.mubr.msk.f32.mxu1 %vm300_vm0, %v289_v21  ;;  %v2295_v25 = vld [vmem:[%s3658_s28 + $0x21] sm:$0xff]  ;;  %v284_v29 = vld [vmem:[%s3658_s28 + $0x50] sm:$0xff]  ;;  %923 = vst [vmem:[#allocation2 + $0x70] sm:$0xff] %v3573_v8  ;;  %924 = vst [vmem:[#allocation2 + $0x78] sm:$0x3] %v3573_v8 }
  0x16   : > { %2708 = vmatmul.mubr.msk.f32.vlgmr.msra.gmra.mrb[0].mxu1 %vm300_vm0, %v290_v22  ;;  %v285_v30 = vld [vmem:[%s3658_s28 + $0x60] sm:$0xff]  ;;  %v2298_v33 = vld [vmem:[%s3658_s28 + $0x51] sm:$0xff]  ;;  %925 = vst [vmem:[#allocation2 + $0x80] sm:$0xff] %v3573_v8  ;;  %926 = vst [vmem:[#allocation2 + $0x88] sm:$0x3] %v3573_v8 }
  0x17   : > { %2727 = vmatmul.mubr.msk.f32.gmra.mrb[2].mxu0 %vm300_vm0, %v282_v20  ;;  %2710 = vmatprep.mubr.msk.f32.mxu1 %vm300_vm0, %v2295_v25  ;;  %v2297_v32 = vld [vmem:[%s3658_s28 + $0x41] sm:$0xff]  ;;  %v286_v34 = vld [vmem:[%s3658_s28 + $0x70] sm:$0xff]  ;;  %927 = vst [vmem:[#allocation2 + $0x90] sm:$0xff] %v3573_v8  ;;  %928 = vst [vmem:[#allocation2 + $0x98] sm:$0x3] %v3573_v8 }
  0x18   : > { %2729 = vmatprep.mubr.msk.f32.mxu0 %vm300_vm0, %v283_v23  ;;  %3310 = vmatpush3.bf16.msra.mxu1 %v3307_v13  ;;  %v2299_v35 = vld [vmem:[%s3658_s28 + $0x61] sm:$0xff]  ;;  %v2300_v38 = vld [vmem:[%s3658_s28 + $0x71] sm:$0xff]  ;;  %v3849_v37 = vld [vmem:[%s4342_s4] ss:$0 sm:$0xff] }
  0x19   : > { %3312 = vmatprep.subr.bf16.mxu1 %v3311_v24  ;;  %v2283_v40 = vld [vmem:[%s3658_s28 + $0x80] sm:$0xff]  ;;  %v2330_v10 = vld [vmem:[%s4343_s5 + $0xf8] sm:$0xff]  ;;  %v2377_v12 = vld [vmem:[%s4343_s5 + $0x270] sm:$0xff] }
  0x1a   : > { %2711 = vmatmul.mubr.msk.f32.gmra.mrb[2].mxu1 %vm300_vm0, %v2296_v28  ;;  %v2301_v47 = vld [vmem:[%s3658_s28 + $0x81] sm:$0xff]  ;;  %v3207_v11 = vpack.c.bf16 %v2330_v10, %v2329_v9  ;;  %v2378_v13 = vld [vmem:[%s4343_s5 + $0x278] sm:$0xff]  ;;  %v2381_v60 = vld [vmem:[%s4343_s5 + $0x290] sm:$0xff] }
  0x1b   : > { %2730 = vmatmul.mubr.msk.f32.gmra.mrb[4].mxu0 %vm300_vm0, %v284_v29  ;;  %2713 = vmatprep.mubr.msk.f32.mxu1 %vm300_vm0, %v2297_v32  ;;  %v2375_v5 = vld [vmem:[%s4343_s5 + $0x260] sm:$0xff]  ;;  %v3335_v14 = vpack.c.bf16 %v2378_v13, %v2377_v12  ;;  %v949_v48 = vld [vmem:[%s4343_s5 + $0x18] sm:$0xff] }
  0x1c   : > { %2732 = vmatprep.mubr.msk.f32.mxu0 %vm300_vm0, %v285_v30  ;;  %3314 = vmatpush3.bf16.msra.mxu1 %v3311_v24  ;;  %v3331_v7 = vpack.c.bf16 %v2376_v6, %v2375_v5  ;;  %v962_v18 = vld [vmem:[#allocation2 + $0x1] sm:$0xff]  ;;  %v2382_v61 = vld [vmem:[%s4343_s5 + $0x298] sm:$0xff] }
  0x1d   : > { %3316 = vmatprep.subr.bf16.mxu1 %v3315_v31  ;;  %v2379_v19 = vld [vmem:[%s4343_s5 + $0x280] sm:$0xff]  ;;  %v3343_v10 = vpack.c.bf16 %v2382_v61, %v2381_v60 }
  0x1e   : > { %2714 = vmatmul.mubr.msk.f32.gmra.mrb[4].mxu1 %vm300_vm0, %v2298_v33  ;;  %v950_v3 = vld [vmem:[%s4343_s5 + $0x20] sm:$0xff] }
  0x1f   : > { %2733 = vmatmul.mubr.msk.f32.gmra.mrb[6].mxu0 %vm300_vm0, %v286_v34  ;;  %2716 = vmatprep.mubr.msk.f32.mxu1 %vm300_vm0, %v2299_v35  ;;  %v2331_v61 = vld [vmem:[%s4343_s5 + $0x100] sm:$0xff] }
  0x20   : > { %2739 = vmatprep.mubr.msk.f32.mxu0 %vm300_vm0, %v280_v15  ;;  %3318 = vmatpush3.bf16.msra.mxu1 %v3315_v31  ;;  %v946_v15 = vld [vmem:[%s4343_s5] sm:$0xff] }
  0x21   : > { %3320 = vmatprep.subr.bf16.mxu1 %v3319_v53  ;;  %v3838_v31 = vld [vmem:[%s4340_s2] ss:$0 sm:$0xff] }
  0x22   : > { %2717 = vmatmul.mubr.msk.f32.gmra.mrb[6].mxu1 %vm300_vm0, %v2300_v38 }
  0x23   : > { %2740 = vmatmul.mubr.msk.f32.vlgmr.msra.gmra.mrb[0].mxu0 %vm300_vm0, %v281_v16  ;;  %v947_v16 = vld [vmem:[%s4343_s5 + $0x8] sm:$0xff] }
  0x24   : > { %3178 = vmatpush3.bf16.msra.mxu0 %v3175_v17  ;;  %2742 = vmatprep.mubr.msk.f32.mxu0 %vm300_vm0, %v282_v20  ;;  %v3211_v17 = vpack.c.bf16 %v947_v16, %v946_v15  ;;  %v2380_v20 = vld [vmem:[%s4343_s5 + $0x288] sm:$0xff] }
  0x25   : > { %3180 = vmatprep.subr.bf16.mxu0 %v3179_v39  ;;  %3322 = vmatpush3.bf16.msra.mxu1 %v3319_v53  ;;  %v3832_v21 = vpack.c.bf16 %v2380_v20, %v2379_v19  ;;  %v2384_v15 = vld [vmem:[%s4343_s5 + $0x2a8] sm:$0xff] }
  0x26   : > { %3324 = vmatprep.subr.bf16.mxu1 %v3323_v59 }
  0x27   : > { %2743 = vmatmul.mubr.msk.f32.gmra.mrb[2].mxu0 %vm300_vm0, %v283_v23 }
  0x28   : > { %2745 = vmatprep.mubr.msk.f32.mxu0 %vm300_vm0, %v284_v29 }
  0x29   : > { %3326 = vmatpush3.bf16.msra.mxu1 %v3323_v59 }
  0x2a   : > { %3328 = vmatprep.subr.bf16.mxu1 %v3327_v1 }
  0x2b   : > { %2746 = vmatmul.mubr.msk.f32.gmra.mrb[4].mxu0 %vm300_vm0, %v285_v30 }
  0x2c   : > { %2748 = vmatprep.mubr.msk.f32.mxu0 %vm300_vm0, %v286_v34  ;;  %v3843_v34 = vld [vmem:[%s4341_s3] ss:$0 sm:$0xff] }
  0x2d   : > { %3330 = vmatpush3.bf16.msra.mxu1 %v3327_v1 }
  0x2e   : > { %3332 = vmatprep.subr.bf16.mxu1 %v3331_v7 }
  0x2f   : > { %2749 = vmatmul.mubr.msk.f32.gmra.mrb[6].mxu0 %vm300_vm0, %v2283_v40 }
  0x30   : > { %2755 = vmatprep.mubr.msk.f32.mxu0 %vm300_vm0, %v290_v22 }
  0x31   : > { %3334 = vmatpush3.bf16.msra.mxu1 %v3331_v7 }
  0x32   : > { %3336 = vmatprep.subr.bf16.mxu1 %v3335_v14 }
  0x33   : > { %2756 = vmatmul.mubr.msk.f32.vlgmr.msra.gmra.mrb[0].mxu0 %vm300_vm0, %v2295_v25 }
  0x34   : > { %2758 = vmatprep.mubr.msk.f32.mxu0 %vm300_vm0, %v2296_v28  ;;  %3182 = vmatpush3.bf16.msra.mxu0 %v3179_v39 }
  0x35   : > { %3184 = vmatprep.subr.bf16.mxu0 %v3183_v43  ;;  %3338 = vmatpush3.bf16.msra.mxu1 %v3335_v14  ;;  %v2383_v14 = vld [vmem:[%s4343_s5 + $0x2a0] sm:$0xff] }
  0x36   : > { %3340 = vmatprep.subr.bf16.mxu1 %v3832_v21 }
  0x37   : > { %2759 = vmatmul.mubr.msk.f32.gmra.mrb[2].mxu0 %vm300_vm0, %v2297_v32 }
  0x38   : > { %2761 = vmatprep.mubr.msk.f32.mxu0 %vm300_vm0, %v2298_v33  ;;  %3186 = vmatpush3.bf16.msra.mxu0 %v3183_v43 }
  0x39   : > { %3188 = vmatprep.subr.bf16.mxu0 %v3187_v46 }
  0x3b   : > { %2762 = vmatmul.mubr.msk.f32.gmra.mrb[4].mxu0 %vm300_vm0, %v2299_v35 }
  0x3c   : > { %2764 = vmatprep.mubr.msk.f32.mxu0 %vm300_vm0, %v2300_v38  ;;  %3190 = vmatpush3.bf16.msra.mxu0 %v3187_v46 }
  0x3d   : > { %3192 = vmatprep.subr.bf16.mxu0 %v3191_v50 }
  0x3f   : > { %2765 = vmatmul.mubr.msk.f32.gmra.mrb[6].mxu0 %vm300_vm0, %v2301_v47  ;;  %v948_v47 = vld [vmem:[%s4343_s5 + $0x10] sm:$0xff] }
  0x40   : > { %3194 = vmatpush3.bf16.msra.mxu0 %v3191_v50  ;;  %2799 = vmatprep.mubr.f32.mxu0 %v962_v18  ;;  %v3215_v59 = vpack.c.bf16 %v949_v48, %v948_v47  ;;  %v958_v48 = vld [vmem:[%s4343_s5 + $0x60] sm:$0xff] }
  0x41   : > { %3196 = vmatprep.subr.bf16.mxu0 %v3195_v56 }
  0x44   : > { %3198 = vmatpush3.bf16.msra.mxu0 %v3195_v56 }
  0x45   : > { %3200 = vmatprep.subr.bf16.mxu0 %v3199_v62 }
  0x48   : > { %3202 = vmatpush3.bf16.msra.mxu0 %v3199_v62 }
  0x49   : > { %3204 = vmatprep.subr.bf16.mxu0 %v3203_v4 }
  0x4c   : > { %3206 = vmatpush3.bf16.msra.mxu0 %v3203_v4  ;;  %v951_v4 = vld [vmem:[%s4343_s5 + $0x28] sm:$0xff] }
  0x4d   : > { %3208 = vmatprep.subr.bf16.mxu0 %v3207_v11  ;;  %v3219_v18 = vpack.c.bf16 %v951_v4, %v950_v3  ;;  %v2333_v3 = vld [vmem:[%s4343_s5 + $0x110] sm:$0xff]  ;;  %v2334_v4 = vld [vmem:[%s4343_s5 + $0x118] sm:$0xff] }
  0x50   : > { %3210 = vmatpush3.bf16.msra.mxu0 %v3207_v11 }
  0x51   : > { %3212 = vmatprep.subr.bf16.mxu0 %v3211_v17 }
  0xe9   : > { %v2709_v22 = vpop.f32.mrb[0].mxu1 }
  0xea   : > { %v391_v23 = vpop.f32.mrb[1].mxu1 }
  0xed   : > { %v2712_v24 = vpop.f32.mrb[2].mxu1 }
  0xee   : > { %v401_v25 = vpop.f32.mrb[3].mxu1 }
  0xf1   : > { %v2715_v26 = vpop.f32.mrb[4].mxu1 }
  0xf2   : > { %v411_v27 = vpop.f32.mrb[5].mxu1 }
  0xf5   : > { %v2718_v28 = vpop.f32.mrb[6].mxu1 }
  0xf6   : > { %v421_v29 = vpop.f32.mrb[7].mxu1 }
 0x106   : > { %v2757_v30 = vpop.f32.mrb[0].mxu0 }
 0x107   : > { %v3467_v32 = vadd.f32 %v2757_v30, %v2709_v22  ;;  %v809_v33 = vpop.f32.mrb[1].mxu0  ;;  %v952_v22 = vld [vmem:[%s4343_s5 + $0x30] sm:$0xff] }
 0x108   : > { %v3468_v35 = vadd.f32 %v809_v33, %v391_v23  ;;  %v953_v23 = vld [vmem:[%s4343_s5 + $0x38] sm:$0xff]  ;;  %v955_v33 = vld [vmem:[%s4343_s5 + $0x48] sm:$0xff] }
 0x109   : > { %v864_v36 = vadd.f32 %v3467_v32, %v3838_v31  ;;  %v954_v32 = vld [vmem:[%s4343_s5 + $0x40] sm:$0xff] }
 0x10a   : > { %v863_v38 = vadd.f32 %v3468_v35, %v3838_v31  ;;  %v2760_v39 = vpop.f32.mrb[2].mxu0 }
 0x10b   : > { %v879_v40 = vmul.f32 %v3843_v34, %v864_v36  ;;  %v3469_v41 = vadd.f32 %v2760_v39, %v2712_v24  ;;  %v819_v42 = vpop.f32.mrb[3].mxu0  ;;  %v2388_v39 = vld [vmem:[%s4343_s5 + $0x2c8] sm:$0xff] }
 0x10c   : > { %v878_v43 = vmul.f32 %v3843_v34, %v863_v38  ;;  %v3470_v44 = vadd.f32 %v819_v42, %v401_v25  ;;  %v3347_v25 = vpack.c.bf16 %v2384_v15, %v2383_v14  ;;  %v2387_v38 = vld [vmem:[%s4343_s5 + $0x2c0] sm:$0xff]  ;;  %v957_v42 = vld [vmem:[%s4343_s5 + $0x58] sm:$0xff]  ;;  %v2336_v14 = vld [vmem:[%s4343_s5 + $0x128] sm:$0xff] }
 0x10d   : > { %v894_v45 = vadd.f32 %v3849_v37, %v879_v40  ;;  %v866_v46 = vadd.f32 %v3469_v41, %v3838_v31  ;;  %v956_v41 = vld [vmem:[%s4343_s5 + $0x50] sm:$0xff] }
 0x10e   : > { %v893_v49 = vadd.f32 %v3849_v37, %v878_v43  ;;  %v865_v50 = vadd.f32 %v3470_v44, %v3838_v31  ;;  %v2763_v51 = vpop.f32.mrb[4].mxu0  ;;  %v3355_v43 = vpack.c.bf16 %v2388_v39, %v2387_v38  ;;  %v2389_v44 = vld [vmem:[%s4343_s5 + $0x2d0] sm:$0xff]  ;;  %v3231_v47 = vpack.c.bf16 %v957_v42, %v956_v41  ;;  %v2340_v38 = vld [vmem:[%s4343_s5 + $0x148] sm:$0xff]  ;;  %v2403_v42 = vld [vmem:[%s4343_s5 + $0x340] sm:$0xff] }
 0x10f   : > { %v3864_v52 = vmax.f32 %v894_v45, 0.0  ;;  %v881_v53 = vmul.f32 %v3843_v34, %v866_v46  ;;  %v3471_v54 = vadd.f32 %v2763_v51, %v2715_v26  ;;  %v829_v55 = vpop.f32.mrb[5].mxu0  ;;  %v2390_v45 = vld [vmem:[%s4343_s5 + $0x2d8] sm:$0xff]  ;;  %v2391_v51 = vld [vmem:[%s4343_s5 + $0x2e0] sm:$0xff] }
 0x110   : > { %v901_v56 = vmax.f32 %v893_v49, 0.0  ;;  %v880_v57 = vmul.f32 %v3843_v34, %v865_v50  ;;  %v3472_v58 = vadd.f32 %v829_v55, %v411_v27  ;;  %v959_v49 = vld [vmem:[%s4343_s5 + $0x68] sm:$0xff]  ;;  %v3359_v50 = vpack.c.bf16 %v2390_v45, %v2389_v44  ;;  %v960_v55 = vld [vmem:[%s4343_s5 + $0x70] sm:$0xff] }
 0x111   : > { %931 = vst [vmem:[#allocation2 + $0x21] sm:$0xff] %v3864_v52  ;;  %v896_v62 = vadd.f32 %v3849_v37, %v881_v53  ;;  %v868_v63 = vadd.f32 %v3471_v54, %v3838_v31  ;;  %v2392_v53 = vld [vmem:[%s4343_s5 + $0x2e8] sm:$0xff]  ;;  %v3235_v54 = vpack.c.bf16 %v959_v49, %v958_v48  ;;  %v2341_v49 = vld [vmem:[%s4343_s5 + $0x150] sm:$0xff] }
 0x112   : > { %930 = vst [vmem:[#allocation2 + $0x11] sm:$0xff] %v901_v56  ;;  %v895_v0 = vadd.f32 %v3849_v37, %v880_v57  ;;  %v867_v1 = vadd.f32 %v3472_v58, %v3838_v31  ;;  %v2766_v2 = vpop.f32.mrb[6].mxu0  ;;  %2800 = vmatmul.mubr.f32.vlgmr.msra.gmra.mrb[8].mxu0 %v901_v56  ;;  %2975 = vmatprep.mubr.f32.mxu1 %v901_v56  ;;  %v961_v56 = vld [vmem:[%s4343_s5 + $0x78] sm:$0xff]  ;;  %v2393_v58 = vld [vmem:[%s4343_s5 + $0x2f0] sm:$0xff] }
 0x113   : > { %v3885_v5 = vmax.f32 %v896_v62, 0.0  ;;  %v883_v6 = vmul.f32 %v3843_v34, %v868_v63  ;;  %v3473_v7 = vadd.f32 %v2766_v2, %v2718_v28  ;;  %v839_v9 = vpop.f32.mrb[7].mxu0  ;;  %3214 = vmatpush3.bf16.msra.mxu0 %v3211_v17  ;;  %2802 = vmatprep.mubr.f32.mxu0 %v3864_v52  ;;  %v2385_v28 = vld [vmem:[%s4343_s5 + $0x2b0] sm:$0xff]  ;;  %v3363_v57 = vpack.c.bf16 %v2392_v53, %v2391_v51  ;;  %v2332_v62 = vld [vmem:[%s4343_s5 + $0x108] sm:$0xff] }
 0x114   : > { %v3889_v11 = vmax.f32 %v895_v0, 0.0  ;;  %v882_v12 = vmul.f32 %v3843_v34, %v867_v1  ;;  %v3474_v13 = vadd.f32 %v839_v9, %v421_v29  ;;  %2976 = vmatmul.mubr.f32.vlgmr.msra.gmra.mrb[8].mxu1 %v3864_v52  ;;  %3216 = vmatprep.subr.bf16.mxu0 %v3215_v59  ;;  %v2386_v29 = vld [vmem:[%s4343_s5 + $0x2b8] sm:$0xff]  ;;  %v3239_v60 = vpack.c.bf16 %v961_v56, %v960_v55  ;;  %v2395_v0 = vld [vmem:[%s4343_s5 + $0x300] sm:$0xff]  ;;  %v2396_v1 = vld [vmem:[%s4343_s5 + $0x308] sm:$0xff] }
 0x115   : > { %933 = vst [vmem:[#allocation2 + $0x41] sm:$0xff] %v3885_v5  ;;  %v898_v16 = vadd.f32 %v3849_v37, %v883_v6  ;;  %v870_v17 = vadd.f32 %v3473_v7, %v3838_v31  ;;  %3342 = vmatpush3.bf16.msra.mxu1 %v3832_v21  ;;  %v3351_v36 = vpack.c.bf16 %v2386_v29, %v2385_v28  ;;  %v2397_v7 = vld [vmem:[%s4343_s5 + $0x310] sm:$0xff]  ;;  %v2398_v9 = vld [vmem:[%s4343_s5 + $0x318] sm:$0xff] }
 0x116   : > { %932 = vst [vmem:[#allocation2 + $0x31] sm:$0xff] %v3889_v11  ;;  %v897_v19 = vadd.f32 %v3849_v37, %v882_v12  ;;  %v869_v20 = vadd.f32 %v3474_v13, %v3838_v31  ;;  %2803 = vmatmul.mubr.f32.gmra.mrb[10].mxu0 %v3889_v11  ;;  %2978 = vmatprep.mubr.f32.mxu1 %v3889_v11  ;;  %v2335_v13 = vld [vmem:[%s4343_s5 + $0x120] sm:$0xff]  ;;  %v2406_v55 = vld [vmem:[%s4343_s5 + $0x358] sm:$0xff] }
 0x117   : > { %v3914_v21 = vmax.f32 %v898_v16, 0.0  ;;  %v885_v24 = vmul.f32 %v3843_v34, %v870_v17  ;;  %3218 = vmatpush3.bf16.msra.mxu0 %v3215_v59  ;;  %3344 = vmatprep.subr.bf16.mxu1 %v3343_v10  ;;  %v3223_v31 = vpack.c.bf16 %v953_v23, %v952_v22  ;;  %v2394_v59 = vld [vmem:[%s4343_s5 + $0x2f8] sm:$0xff]  ;;  %v3243_v2 = vpack.c.bf16 %v2332_v62, %v2331_v61  ;;  %v2408_v61 = vld [vmem:[%s4343_s5 + $0x368] sm:$0xff] }
 0x118   : > { %v3917_v26 = vmax.f32 %v897_v19, 0.0  ;;  %v884_v27 = vmul.f32 %v3843_v34, %v869_v20  ;;  %2805 = vmatprep.mubr.f32.mxu0 %v3885_v5  ;;  %2979 = vmatmul.mubr.f32.gmra.mrb[10].mxu1 %v3885_v5  ;;  %v3367_v63 = vpack.c.bf16 %v2394_v59, %v2393_v58  ;;  %v3371_v6 = vpack.c.bf16 %v2396_v1, %v2395_v0  ;;  %v4030_v15 = vld [vmem:[#allocation2 + $0x20] sm:$0xff]  ;;  %v2400_v19 = vld [vmem:[%s4343_s5 + $0x328] sm:$0xff]  ;;  %v2346_v0 = vld [vmem:[%s4343_s5 + $0x178] sm:$0xff] }
 0x119   : > { %935 = vst [vmem:[#allocation2 + $0x61] sm:$0xff] %v3914_v21  ;;  %v900_v30 = vadd.f32 %v3849_v37, %v885_v24  ;;  %3346 = vmatpush3.bf16.msra.mxu1 %v3343_v10  ;;  %3220 = vmatprep.subr.bf16.mxu0 %v3219_v18  ;;  %v3969_v46 = vld [vmem:[#allocation2 + $0x12] sm:$0xff]  ;;  %v3247_v10 = vpack.c.bf16 %v2334_v4, %v2333_v3  ;;  %v4033_v17 = vld [vmem:[#allocation2 + $0x22] sm:$0xff] }
 0x11a   : > { %934 = vst [vmem:[#allocation2 + $0x51] sm:$0xff] %v3917_v26  ;;  %v899_v34 = vadd.f32 %v3849_v37, %v884_v27  ;;  %2806 = vmatmul.mubr.f32.gmra.mrb[12].mxu0 %v3917_v26  ;;  %2981 = vmatprep.mubr.f32.mxu1 %v3917_v26  ;;  %v3227_v37 = vpack.c.bf16 %v955_v33, %v954_v32  ;;  %v4021_v12 = vld [vmem:[#allocation2 + $0x10] sm:$0xff]  ;;  %v2344_v58 = vld [vmem:[%s4343_s5 + $0x168] sm:$0xff]  ;;  %v2410_v3 = vld [vmem:[%s4343_s5 + $0x378] sm:$0xff] }
 0x11b   : > { %v3940_v35 = vmax.f32 %v900_v30, 0.0  ;;  %3222 = vmatpush3.bf16.msra.mxu0 %v3219_v18  ;;  %3348 = vmatprep.subr.bf16.mxu1 %v3347_v25  ;;  %v3375_v16 = vpack.c.bf16 %v2398_v9, %v2397_v7  ;;  %v2399_v18 = vld [vmem:[%s4343_s5 + $0x320] sm:$0xff]  ;;  %v3251_v22 = vpack.c.bf16 %v2336_v14, %v2335_v13  ;;  %v2337_v24 = vld [vmem:[%s4343_s5 + $0x130] sm:$0xff]  ;;  %v2348_v7 = vld [vmem:[%s4343_s5 + $0x188] sm:$0xff] }
 0x11c   : > { %v3948_v40 = vmax.f32 %v899_v34, 0.0  ;;  %2808 = vmatprep.mubr.f32.mxu0 %v3914_v21  ;;  %2982 = vmatmul.mubr.f32.gmra.mrb[12].mxu1 %v3914_v21  ;;  %v4054_v27 = vld [vmem:[#allocation2 + $0x40] sm:$0xff]  ;;  %v3379_v28 = vpack.c.bf16 %v2400_v19, %v2399_v18  ;;  %v2401_v30 = vld [vmem:[%s4343_s5 + $0x330] sm:$0xff]  ;;  %v2412_v13 = vld [vmem:[%s4343_s5 + $0x388] sm:$0xff] }
 0x11d   : > { %937 = vst [vmem:[#allocation2 + $0x81] sm:$0xff] %v3940_v35  ;;  %3350 = vmatpush3.bf16.msra.mxu1 %v3347_v25  ;;  %3224 = vmatprep.subr.bf16.mxu0 %v3223_v31  ;;  %v4042_v20 = vld [vmem:[#allocation2 + $0x32] sm:$0xff]  ;;  %v4057_v29 = vld [vmem:[#allocation2 + $0x42] sm:$0xff] }
 0x11e   : > { %936 = vst [vmem:[#allocation2 + $0x71] sm:$0xff] %v3948_v40  ;;  %2809 = vmatmul.mubr.f32.gmra.mrb[14].mxu0 %v3948_v40  ;;  %2984 = vmatprep.mubr.f32.mxu1 %v3948_v40  ;;  %v4045_v23 = vld [vmem:[#allocation2 + $0x30] sm:$0xff]  ;;  %v2338_v25 = vld [vmem:[%s4343_s5 + $0x138] sm:$0xff] }
 0x11f   : > { %3226 = vmatpush3.bf16.msra.mxu0 %v3223_v31  ;;  %3352 = vmatprep.subr.bf16.mxu1 %v3351_v36  ;;  %v2402_v31 = vld [vmem:[%s4343_s5 + $0x338] sm:$0xff]  ;;  %v3255_v33 = vpack.c.bf16 %v2338_v25, %v2337_v24 }
 0x120   : > { %2985 = vmatmul.mubr.f32.gmra.mrb[14].mxu1 %v3940_v35  ;;  %3228 = vmatprep.subr.bf16.mxu0 %v3227_v37  ;;  %v4078_v39 = vld [vmem:[#allocation2 + $0x60] sm:$0xff]  ;;  %v2350_v18 = vld [vmem:[%s4343_s5 + $0x198] sm:$0xff] }
 0x121   : > { %3354 = vmatpush3.bf16.msra.mxu1 %v3351_v36  ;;  %3019 = vmatprep.mubr.f32.mxu1 %v3969_v46  ;;  %v4066_v32 = vld [vmem:[#allocation2 + $0x52] sm:$0xff]  ;;  %v2339_v36 = vld [vmem:[%s4343_s5 + $0x140] sm:$0xff] }
 0x122   : > { %3356 = vmatprep.subr.bf16.mxu1 %v3355_v43  ;;  %2843 = vmatprep.mubr.f32.mxu0 %v3573_v8  ;;  %v4069_v34 = vld [vmem:[#allocation2 + $0x50] sm:$0xff]  ;;  %v4081_v41 = vld [vmem:[#allocation2 + $0x62] sm:$0xff]  ;;  %v3259_v45 = vpack.c.bf16 %v2340_v38, %v2339_v36  ;;  %v2414_v24 = vld [vmem:[%s4343_s5 + $0x398] sm:$0xff] }
 0x123   : > { %3230 = vmatpush3.bf16.msra.mxu0 %v3227_v37  ;;  %v3383_v37 = vpack.c.bf16 %v2402_v31, %v2401_v30  ;;  %v2352_v30 = vld [vmem:[%s4343_s5 + $0x1a8] sm:$0xff] }
 0x124   : > { %3232 = vmatprep.subr.bf16.mxu0 %v3231_v47  ;;  %v4102_v53 = vld [vmem:[#allocation2 + $0x82] sm:$0xff] }
 0x125   : > { %3358 = vmatpush3.bf16.msra.mxu1 %v3355_v43  ;;  %v2404_v43 = vld [vmem:[%s4343_s5 + $0x348] sm:$0xff]  ;;  %v4090_v44 = vld [vmem:[#allocation2 + $0x72] sm:$0xff] }
 0x126   : > { %3360 = vmatprep.subr.bf16.mxu1 %v3359_v50  ;;  %v4093_v48 = vld [vmem:[#allocation2 + $0x70] sm:$0xff]  ;;  %v3387_v51 = vpack.c.bf16 %v2404_v43, %v2403_v42  ;;  %v2416_v36 = vld [vmem:[%s4343_s5 + $0x3a8] sm:$0xff] }
 0x127   : > { %3234 = vmatpush3.bf16.msra.mxu0 %v3231_v47  ;;  %v1197_v47 = vld [vmem:[#allocation2 + $0x2] sm:$0xff]  ;;  %v2417_v43 = vld [vmem:[%s4343_s5 + $0x3b0] sm:$0xff] }
 0x128   : > { %3236 = vmatprep.subr.bf16.mxu0 %v3235_v54 }
 0x129   : > { %3362 = vmatpush3.bf16.msra.mxu1 %v3359_v50  ;;  %v2342_v50 = vld [vmem:[%s4343_s5 + $0x158] sm:$0xff] }
 0x12a   : > { %3364 = vmatprep.subr.bf16.mxu1 %v3363_v57  ;;  %v3263_v56 = vpack.c.bf16 %v2342_v50, %v2341_v49  ;;  %v2355_v49 = vld [vmem:[%s4343_s5 + $0x1c0] sm:$0xff]  ;;  %v2356_v50 = vld [vmem:[%s4343_s5 + $0x1c8] sm:$0xff] }
 0x12b   : > { %3238 = vmatpush3.bf16.msra.mxu0 %v3235_v54  ;;  %v2405_v54 = vld [vmem:[%s4343_s5 + $0x350] sm:$0xff] }
 0x12c   : > { %3240 = vmatprep.subr.bf16.mxu0 %v3239_v60  ;;  %v3391_v59 = vpack.c.bf16 %v2406_v55, %v2405_v54  ;;  %v2419_v54 = vld [vmem:[%s4343_s5 + $0x3c0] sm:$0xff]  ;;  %v2420_v55 = vld [vmem:[%s4343_s5 + $0x3c8] sm:$0xff] }
 0x12d   : > { %3366 = vmatpush3.bf16.msra.mxu1 %v3363_v57  ;;  %v2343_v57 = vld [vmem:[%s4343_s5 + $0x160] sm:$0xff] }
 0x12e   : > { %3368 = vmatprep.subr.bf16.mxu1 %v3367_v63  ;;  %v3267_v62 = vpack.c.bf16 %v2344_v58, %v2343_v57  ;;  %v3291_v57 = vpack.c.bf16 %v2356_v50, %v2355_v49  ;;  %v2357_v58 = vld [vmem:[%s4343_s5 + $0x1d0] sm:$0xff] }
 0x12f   : > { %3242 = vmatpush3.bf16.msra.mxu0 %v3239_v60  ;;  %v2407_v60 = vld [vmem:[%s4343_s5 + $0x360] sm:$0xff] }
 0x130   : > { %3244 = vmatprep.subr.bf16.mxu0 %v3243_v2  ;;  %v3395_v1 = vpack.c.bf16 %v2408_v61, %v2407_v60  ;;  %v3419_v60 = vpack.c.bf16 %v2420_v55, %v2419_v54  ;;  %v2421_v61 = vld [vmem:[%s4343_s5 + $0x3d0] sm:$0xff] }
 0x131   : > { %3370 = vmatpush3.bf16.msra.mxu1 %v3367_v63  ;;  %v2345_v63 = vld [vmem:[%s4343_s5 + $0x170] sm:$0xff] }
 0x132   : > { %2844 = vmatmul.mubr.f32.vlgmr.msra.gmra.mrb[8].mxu0 %v4021_v12  ;;  %3372 = vmatprep.subr.bf16.mxu1 %v3371_v6  ;;  %v3271_v4 = vpack.c.bf16 %v2346_v0, %v2345_v63  ;;  %v2359_v0 = vld [vmem:[%s4343_s5 + $0x1e0] sm:$0xff] }
 0x133   : > { %2846 = vmatprep.mubr.f32.mxu0 %v4030_v15  ;;  %3246 = vmatpush3.bf16.msra.mxu0 %v3243_v2  ;;  %v2409_v2 = vld [vmem:[%s4343_s5 + $0x370] sm:$0xff] }
 0x134   : > { %3020 = vmatmul.mubr.f32.vlgmr.msra.gmra.mrb[8].mxu1 %v4033_v17  ;;  %3248 = vmatprep.subr.bf16.mxu0 %v3247_v10  ;;  %v3399_v9 = vpack.c.bf16 %v2410_v3, %v2409_v2  ;;  %v2424_v2 = vld [vmem:[%s4343_s5 + $0x3e8] sm:$0xff]  ;;  %v2361_v3 = vld [vmem:[%s4343_s5 + $0x1f0] sm:$0xff] }
 0x135   : > { %3022 = vmatprep.mubr.f32.mxu1 %v4042_v20  ;;  %3374 = vmatpush3.bf16.msra.mxu1 %v3371_v6  ;;  %v2347_v6 = vld [vmem:[%s4343_s5 + $0x180] sm:$0xff] }
 0x136   : > { %2847 = vmatmul.mubr.f32.gmra.mrb[10].mxu0 %v4045_v23  ;;  %3376 = vmatprep.subr.bf16.mxu1 %v3375_v16  ;;  %v3275_v14 = vpack.c.bf16 %v2348_v7, %v2347_v6  ;;  %v2425_v7 = vld [vmem:[%s4343_s5 + $0x3f0] sm:$0xff] }
 0x137   : > { %2849 = vmatprep.mubr.f32.mxu0 %v4054_v27  ;;  %3250 = vmatpush3.bf16.msra.mxu0 %v3247_v10  ;;  %v2411_v10 = vld [vmem:[%s4343_s5 + $0x380] sm:$0xff] }
 0x138   : > { %3023 = vmatmul.mubr.f32.gmra.mrb[10].mxu1 %v4057_v29  ;;  %3252 = vmatprep.subr.bf16.mxu0 %v3251_v22  ;;  %v3403_v19 = vpack.c.bf16 %v2412_v13, %v2411_v10 }
 0x139   : > { %3025 = vmatprep.mubr.f32.mxu1 %v4066_v32  ;;  %3378 = vmatpush3.bf16.msra.mxu1 %v3375_v16  ;;  %v2349_v16 = vld [vmem:[%s4343_s5 + $0x190] sm:$0xff] }
 0x13a   : > { %2850 = vmatmul.mubr.f32.gmra.mrb[12].mxu0 %v4069_v34  ;;  %3380 = vmatprep.subr.bf16.mxu1 %v3379_v28  ;;  %v3279_v25 = vpack.c.bf16 %v2350_v18, %v2349_v16  ;;  %v2428_v16 = vld [vmem:[%s4343_s5 + $0x408] sm:$0xff] }
 0x13b   : > { %2852 = vmatprep.mubr.f32.mxu0 %v4078_v39  ;;  %3254 = vmatpush3.bf16.msra.mxu0 %v3251_v22  ;;  %v2413_v22 = vld [vmem:[%s4343_s5 + $0x390] sm:$0xff] }
 0x13c   : > { %3026 = vmatmul.mubr.f32.gmra.mrb[12].mxu1 %v4081_v41  ;;  %3256 = vmatprep.subr.bf16.mxu0 %v3255_v33  ;;  %v3407_v31 = vpack.c.bf16 %v2414_v24, %v2413_v22  ;;  %v2430_v22 = vld [vmem:[%s4343_s5 + $0x418] sm:$0xff] }
 0x13d   : > { %3028 = vmatprep.mubr.f32.mxu1 %v4090_v44  ;;  %3382 = vmatpush3.bf16.msra.mxu1 %v3379_v28  ;;  %v2351_v28 = vld [vmem:[%s4343_s5 + $0x1a0] sm:$0xff] }
 0x13e   : > { %2853 = vmatmul.mubr.f32.gmra.mrb[14].mxu0 %v4093_v48  ;;  %3384 = vmatprep.subr.bf16.mxu1 %v3383_v37  ;;  %v3283_v38 = vpack.c.bf16 %v2352_v30, %v2351_v28  ;;  %v2432_v28 = vld [vmem:[%s4343_s5 + $0x428] sm:$0xff]  ;;  %v2434_v30 = vld [vmem:[%s4343_s5 + $0x438] sm:$0xff] }
 0x13f   : > { %3258 = vmatpush3.bf16.msra.mxu0 %v3255_v33  ;;  %2887 = vmatprep.mubr.f32.mxu0 %v1197_v47  ;;  %v2415_v33 = vld [vmem:[%s4343_s5 + $0x3a0] sm:$0xff] }
 0x140   : > { %3029 = vmatmul.mubr.f32.gmra.mrb[14].mxu1 %v4102_v53  ;;  %3260 = vmatprep.subr.bf16.mxu0 %v3259_v45  ;;  %v3411_v42 = vpack.c.bf16 %v2416_v36, %v2415_v33  ;;  %v2441_v33 = vld [vmem:[%s4343_s5 + $0x470] sm:$0xff] }
 0x141   : > { %3386 = vmatpush3.bf16.msra.mxu1 %v3383_v37  ;;  %3063 = vmatprep.mubr.f32.mxu1 %v4030_v15  ;;  %v2354_v37 = vld [vmem:[%s4343_s5 + $0x1b8] sm:$0xff] }
 0x142   : > { %3388 = vmatprep.subr.bf16.mxu1 %v3387_v51 }
 0x143   : > { %3262 = vmatpush3.bf16.msra.mxu0 %v3259_v45  ;;  %v2418_v45 = vld [vmem:[%s4343_s5 + $0x3b8] sm:$0xff] }
 0x144   : > { %3264 = vmatprep.subr.bf16.mxu0 %v3263_v56 }
 0x145   : > { %3390 = vmatpush3.bf16.msra.mxu1 %v3387_v51  ;;  %v3415_v51 = vpack.c.bf16 %v2418_v45, %v2417_v43 }
 0x146   : > { %3392 = vmatprep.subr.bf16.mxu1 %v3391_v59 }
 0x147   : > { %3266 = vmatpush3.bf16.msra.mxu0 %v3263_v56  ;;  %v4207_v56 = vld [vmem:[#allocation2 + $0x80] sm:$0xff] }
 0x148   : > { %3268 = vmatprep.subr.bf16.mxu0 %v3267_v62 }
 0x149   : > { %3394 = vmatpush3.bf16.msra.mxu1 %v3391_v59  ;;  %v2358_v59 = vld [vmem:[%s4343_s5 + $0x1d8] sm:$0xff] }
 0x14a   : > { %3396 = vmatprep.subr.bf16.mxu1 %v3395_v1  ;;  %v3295_v63 = vpack.c.bf16 %v2358_v59, %v2357_v58 }
 0x14b   : > { %3270 = vmatpush3.bf16.msra.mxu0 %v3267_v62  ;;  %v2422_v62 = vld [vmem:[%s4343_s5 + $0x3d8] sm:$0xff] }
 0x14c   : > { %3272 = vmatprep.subr.bf16.mxu0 %v3271_v4 }
 0x14d   : > { %3398 = vmatpush3.bf16.msra.mxu1 %v3395_v1  ;;  %v3423_v1 = vpack.c.bf16 %v2422_v62, %v2421_v61 }
 0x14e   : > { %3400 = vmatprep.subr.bf16.mxu1 %v3399_v9 }
 0x14f   : > { %3274 = vmatpush3.bf16.msra.mxu0 %v3271_v4  ;;  %v2362_v4 = vld [vmem:[%s4343_s5 + $0x1f8] sm:$0xff] }
 0x150   : > { %3276 = vmatprep.subr.bf16.mxu0 %v3275_v14  ;;  %v3303_v10 = vpack.c.bf16 %v2362_v4, %v2361_v3 }
 0x151   : > { %3402 = vmatpush3.bf16.msra.mxu1 %v3399_v9  ;;  %v2426_v9 = vld [vmem:[%s4343_s5 + $0x3f8] sm:$0xff] }
 0x152   : > { %2888 = vmatmul.mubr.f32.vlgmr.msra.gmra.mrb[8].mxu0 %v3969_v46  ;;  %3404 = vmatprep.subr.bf16.mxu1 %v3403_v19  ;;  %v2353_v46 = vld [vmem:[%s4343_s5 + $0x1b0] sm:$0xff]  ;;  %v3431_v13 = vpack.c.bf16 %v2426_v9, %v2425_v7 }
 0x153   : > { %2890 = vmatprep.mubr.f32.mxu0 %v4033_v17  ;;  %3278 = vmatpush3.bf16.msra.mxu0 %v3275_v14  ;;  %v3287_v47 = vpack.c.bf16 %v2354_v37, %v2353_v46  ;;  %v2427_v14 = vld [vmem:[%s4343_s5 + $0x400] sm:$0xff] }
 0x154   : > { %3064 = vmatmul.mubr.f32.vlgmr.msra.gmra.mrb[8].mxu1 %v4045_v23  ;;  %3280 = vmatprep.subr.bf16.mxu0 %v3279_v25  ;;  %v3435_v18 = vpack.c.bf16 %v2428_v16, %v2427_v14 }
 0x155   : > { %3066 = vmatprep.mubr.f32.mxu1 %v4054_v27  ;;  %3406 = vmatpush3.bf16.msra.mxu1 %v3403_v19  ;;  %v2429_v19 = vld [vmem:[%s4343_s5 + $0x410] sm:$0xff] }
 0x156   : > { %2891 = vmatmul.mubr.f32.gmra.mrb[10].mxu0 %v4042_v20  ;;  %3408 = vmatprep.subr.bf16.mxu1 %v3407_v31  ;;  %v3439_v24 = vpack.c.bf16 %v2430_v22, %v2429_v19 }
 0x157   : > { %2893 = vmatprep.mubr.f32.mxu0 %v4057_v29  ;;  %3282 = vmatpush3.bf16.msra.mxu0 %v3279_v25  ;;  %v2431_v25 = vld [vmem:[%s4343_s5 + $0x420] sm:$0xff] }
 0x158   : > { %3067 = vmatmul.mubr.f32.gmra.mrb[10].mxu1 %v4069_v34  ;;  %3284 = vmatprep.subr.bf16.mxu0 %v3283_v38 }
 0x159   : > { %3069 = vmatprep.mubr.f32.mxu1 %v4078_v39  ;;  %3410 = vmatpush3.bf16.msra.mxu1 %v3407_v31 }
 0x15a   : > { %2894 = vmatmul.mubr.f32.gmra.mrb[12].mxu0 %v4066_v32  ;;  %3412 = vmatprep.subr.bf16.mxu1 %v3411_v42 }
 0x15b   : > { %2896 = vmatprep.mubr.f32.mxu0 %v4081_v41  ;;  %3286 = vmatpush3.bf16.msra.mxu0 %v3283_v38  ;;  %v2033_v38 = vld [vmem:[#allocation2 + $0x92] sm:$0xff] }
 0x15c   : > { %3070 = vmatmul.mubr.f32.gmra.mrb[12].mxu1 %v4093_v48  ;;  %3288 = vmatprep.subr.bf16.mxu0 %v3287_v47 }
 0x15d   : > { %3072 = vmatprep.mubr.f32.mxu1 %v4207_v56  ;;  %3414 = vmatpush3.bf16.msra.mxu1 %v3411_v42 }
 0x15e   : > { %2897 = vmatmul.mubr.f32.gmra.mrb[14].mxu0 %v4090_v44  ;;  %3416 = vmatprep.subr.bf16.mxu1 %v3415_v51 }
 0x15f   : > { %3290 = vmatpush3.bf16.msra.mxu0 %v3287_v47  ;;  %2931 = vmatprep.mubr.f32.mxu0 %v4021_v12  ;;  %v2360_v12 = vld [vmem:[%s4343_s5 + $0x1e8] sm:$0xff] }
 0x160   : > { %3073 = vmatmul.mubr.f32.gmra.mrb[14].mxu1 %v3573_v8  ;;  %3292 = vmatprep.subr.bf16.mxu0 %v3291_v57  ;;  %v2423_v8 = vld [vmem:[%s4343_s5 + $0x3e0] sm:$0xff] }
 0x161   : > { %3418 = vmatpush3.bf16.msra.mxu1 %v3415_v51  ;;  %3107 = vmatprep.mubr.f32.mxu1 %v3864_v52  ;;  %v3299_v52 = vpack.c.bf16 %v2360_v12, %v2359_v0  ;;  %v3427_v6 = vpack.c.bf16 %v2424_v2, %v2423_v8 }
 0x162   : > { %3420 = vmatprep.subr.bf16.mxu1 %v3419_v60 }
 0x163   : > { %3294 = vmatpush3.bf16.msra.mxu0 %v3291_v57 }
 0x164   : > { %3296 = vmatprep.subr.bf16.mxu0 %v3295_v63 }
 0x165   : > { %3422 = vmatpush3.bf16.msra.mxu1 %v3419_v60 }
 0x166   : > { %3424 = vmatprep.subr.bf16.mxu1 %v3423_v1 }
 0x167   : > { %3298 = vmatpush3.bf16.msra.mxu0 %v3295_v63 }
 0x168   : > { %3300 = vmatprep.subr.bf16.mxu0 %v3299_v52 }
 0x169   : > { %3426 = vmatpush3.bf16.msra.mxu1 %v3423_v1 }
 0x16a   : > { %3428 = vmatprep.subr.bf16.mxu1 %v3427_v6 }
 0x16b   : > { %3302 = vmatpush3.bf16.msra.mxu0 %v3299_v52 }
 0x16c   : > { %3304 = vmatprep.subr.bf16.mxu0 %v3303_v10 }
 0x16d   : > { %3430 = vmatpush3.bf16.msra.mxu1 %v3427_v6 }
 0x16e   : > { %3432 = vmatprep.subr.bf16.mxu1 %v3431_v13 }
 0x16f   : > { %3306 = vmatpush3.bf16.msra.mxu0 %v3303_v10 }
 0x171   : > { %3434 = vmatpush3.bf16.msra.mxu1 %v3431_v13 }
 0x172   : > { %2932 = vmatmul.mubr.f32.vlgmr.msra.gmra.mrb[8].mxu0 %v4030_v15  ;;  %3436 = vmatprep.subr.bf16.mxu1 %v3435_v18  ;;  %v3443_v15 = vpack.c.bf16 %v2432_v28, %v2431_v25 }
 0x173   : > { %2934 = vmatprep.mubr.f32.mxu0 %v4045_v23  ;;  %v2433_v23 = vld [vmem:[%s4343_s5 + $0x430] sm:$0xff] }
 0x174   : > { %3108 = vmatmul.mubr.f32.vlgmr.msra.gmra.mrb[8].mxu1 %v3889_v11  ;;  %v2435_v11 = vld [vmem:[%s4343_s5 + $0x440] sm:$0xff] }
 0x175   : > { %3110 = vmatprep.mubr.f32.mxu1 %v3885_v5  ;;  %3438 = vmatpush3.bf16.msra.mxu1 %v3435_v18  ;;  %v3447_v5 = vpack.c.bf16 %v2434_v30, %v2433_v23 }
 0x176   : > { %2935 = vmatmul.mubr.f32.gmra.mrb[10].mxu0 %v4054_v27  ;;  %3440 = vmatprep.subr.bf16.mxu1 %v3439_v24  ;;  %v2436_v27 = vld [vmem:[%s4343_s5 + $0x448] sm:$0xff] }
 0x177   : > { %2937 = vmatprep.mubr.f32.mxu0 %v4069_v34  ;;  %v2437_v34 = vld [vmem:[%s4343_s5 + $0x450] sm:$0xff] }
 0x178   : > { %3111 = vmatmul.mubr.f32.gmra.mrb[10].mxu1 %v3917_v26  ;;  %v3451_v26 = vpack.c.bf16 %v2436_v27, %v2435_v11 }
 0x179   : > { %3113 = vmatprep.mubr.f32.mxu1 %v3914_v21  ;;  %3442 = vmatpush3.bf16.msra.mxu1 %v3439_v24  ;;  %v1895_v21 = vld [vmem:[#allocation2 + $0x91] sm:$0xff] }
 0x17a   : > { %2938 = vmatmul.mubr.f32.gmra.mrb[12].mxu0 %v4078_v39  ;;  %3444 = vmatprep.subr.bf16.mxu1 %v3443_v15  ;;  %v2438_v39 = vld [vmem:[%s4343_s5 + $0x458] sm:$0xff] }
 0x17b   : > { %2940 = vmatprep.mubr.f32.mxu0 %v4093_v48  ;;  %v2440_v48 = vld [vmem:[%s4343_s5 + $0x468] sm:$0xff] }
 0x17c   : > { %3114 = vmatmul.mubr.f32.gmra.mrb[12].mxu1 %v3948_v40  ;;  %v2439_v40 = vld [vmem:[%s4343_s5 + $0x460] sm:$0xff] }
 0x17d   : > { %3116 = vmatprep.mubr.f32.mxu1 %v3940_v35  ;;  %3446 = vmatpush3.bf16.msra.mxu1 %v3443_v15  ;;  %v3455_v35 = vpack.c.bf16 %v2438_v39, %v2437_v34  ;;  %v3459_v31 = vpack.c.bf16 %v2440_v48, %v2439_v40 }
 0x17e   : > { %2941 = vmatmul.mubr.f32.gmra.mrb[14].mxu0 %v4207_v56  ;;  %3448 = vmatprep.subr.bf16.mxu1 %v3447_v5 }
 0x180   : > { %3117 = vmatmul.mubr.f32.gmra.mrb[14].mxu1 %v1895_v21 }
 0x181   : > { %3450 = vmatpush3.bf16.msra.mxu1 %v3447_v5  ;;  %3151 = vmatprep.mubr.f32.mxu1 %v4033_v17  ;;  %v2442_v17 = vld [vmem:[%s4343_s5 + $0x478] sm:$0xff] }
 0x182   : > { %3452 = vmatprep.subr.bf16.mxu1 %v3451_v26  ;;  %v3463_v36 = vpack.c.bf16 %v2442_v17, %v2441_v33 }
 0x185   : > { %3454 = vmatpush3.bf16.msra.mxu1 %v3451_v26 }
 0x186   : > { %3456 = vmatprep.subr.bf16.mxu1 %v3455_v35 }
 0x189   : > { %3458 = vmatpush3.bf16.msra.mxu1 %v3455_v35 }
 0x18a   : > { %3460 = vmatprep.subr.bf16.mxu1 %v3459_v31 }
 0x18d   : > { %3462 = vmatpush3.bf16.msra.mxu1 %v3459_v31 }
 0x18e   : > { %3464 = vmatprep.subr.bf16.mxu1 %v3463_v36 }
 0x191   : > { %3466 = vmatpush3.bf16.msra.mxu1 %v3463_v36 }
 0x194   : > { %3152 = vmatmul.mubr.f32.vlgmr.msra.gmra.mrb[8].mxu1 %v4042_v20 }
 0x195   : > { %3154 = vmatprep.mubr.f32.mxu1 %v4057_v29 }
 0x198   : > { %3155 = vmatmul.mubr.f32.gmra.mrb[10].mxu1 %v4066_v32  ;;  %v2443_v32 = vld [vmem:[%s4344_s6] ss:$0 sm:$0xff] }
 0x199   : > { %3157 = vmatprep.mubr.f32.mxu1 %v4081_v41 }
 0x19c   : > { %3158 = vmatmul.mubr.f32.gmra.mrb[12].mxu1 %v4090_v44 }
 0x19d   : > { %3160 = vmatprep.mubr.f32.mxu1 %v4102_v53 }
 0x1a0   : > { %3161 = vmatmul.mubr.f32.gmra.mrb[14].mxu1 %v2033_v38 }
 0x245   : > { %v2933_v46 = vpop.f32.mrb[8].mxu0 }
 0x246   : > { %v1426_v37 = vpop.f32.mrb[9].mxu0 }
 0x249   : > { %v2936_v42 = vpop.f32.mrb[10].mxu0 }
 0x24a   : > { %v1436_v43 = vpop.f32.mrb[11].mxu0 }
 0x24d   : > { %v2939_v45 = vpop.f32.mrb[12].mxu0 }
 0x24e   : > { %v1446_v47 = vpop.f32.mrb[13].mxu0 }
 0x251   : > { %v2942_v20 = vpop.f32.mrb[14].mxu0 }
 0x252   : > { %v1456_v49 = vpop.f32.mrb[15].mxu0 }
 0x267   : > { %v3153_v29 = vpop.f32.mrb[8].mxu1 }
 0x268   : > { %v3475_v41 = vadd.f32 %v3153_v29, %v2933_v46  ;;  %v2117_v44 = vpop.f32.mrb[9].mxu1 }
 0x269   : > { %v3476_v50 = vadd.f32 %v2117_v44, %v1426_v37 }
 0x26a   : > { %v2172_v53 = vadd.f32 %v3475_v41, %v2443_v32 }
 0x26b   : > { %v2171_v51 = vadd.f32 %v3476_v50, %v2443_v32  ;;  %v3156_v54 = vpop.f32.mrb[10].mxu1 }
 0x26c   : > { %v2180_v55 = vmax.f32 %v2172_v53, 0.0  ;;  %v3477_v56 = vadd.f32 %v3156_v54, %v2936_v42  ;;  %v2127_v57 = vpop.f32.mrb[11].mxu1 }
 0x26d   : > { %v2179_v58 = vmax.f32 %v2171_v51, 0.0  ;;  %v3478_v59 = vadd.f32 %v2127_v57, %v1436_v43 }
 0x26e   : > { %2188 = vst [vmem:[%s4325_s8 + $0x8] sm:$0xff] %v2180_v55  ;;  %v2174_v60 = vadd.f32 %v3477_v56, %v2443_v32 }
 0x26f   : > { %2187 = vst [vmem:[%s4325_s8] sm:$0xff] %v2179_v58  ;;  %v2173_v61 = vadd.f32 %v3478_v59, %v2443_v32  ;;  %v3159_v62 = vpop.f32.mrb[12].mxu1 }
 0x270   : > { %v2182_v63 = vmax.f32 %v2174_v60, 0.0  ;;  %v3479_v0 = vadd.f32 %v3159_v62, %v2939_v45  ;;  %v2137_v12 = vpop.f32.mrb[13].mxu1 }
 0x271   : > { %v2181_v1 = vmax.f32 %v2173_v61, 0.0  ;;  %v3480_v8 = vadd.f32 %v2137_v12, %v1446_v47 }
 0x272   : > { %2190 = vst [vmem:[%s4325_s8 + $0x18] sm:$0xff] %v2182_v63  ;;  %v2176_v2 = vadd.f32 %v3479_v0, %v2443_v32 }
 0x273   : > { %2189 = vst [vmem:[%s4325_s8 + $0x10] sm:$0xff] %v2181_v1  ;;  %v2175_v52 = vadd.f32 %v3480_v8, %v2443_v32  ;;  %v3162_v3 = vpop.f32.mrb[14].mxu1 }
 0x274   : > { %v2184_v4 = vmax.f32 %v2176_v2, 0.0  ;;  %v3481_v6 = vadd.f32 %v3162_v3, %v2942_v20  ;;  %v2147_v7 = vpop.f32.mrb[15].mxu1 }
 0x275   : > { %v2183_v9 = vmax.f32 %v2175_v52, 0.0  ;;  %v3482_v10 = vadd.f32 %v2147_v7, %v1456_v49 }
 0x276   : > { %2192 = vst [vmem:[%s4325_s8 + $0x28] sm:$0xff] %v2184_v4  ;;  %v2178_v13 = vadd.f32 %v3481_v6, %v2443_v32 }
 0x277   : > { %2191 = vst [vmem:[%s4325_s8 + $0x20] sm:$0xff] %v2183_v9  ;;  %v2177_v14 = vadd.f32 %v3482_v10, %v2443_v32 }
 0x278   : > { %v2186_v16 = vmax.f32 %v2178_v13, 0.0 }
 0x279   : > { %v2185_v18 = vmax.f32 %v2177_v14, 0.0 }
 0x27a   : > { %2194 = vst [vmem:[%s4325_s8 + $0x38] sm:$0xff] %v2186_v16 }
 0x27b   : > { %2193 = vst [vmem:[%s4325_s8 + $0x30] sm:$0xff] %v2185_v18 }
 0x27c PF: > { %s17_s24 = sadd.s32 1, %s3571_s24  }
 0x27d   : > { %p14_p4 = scmp.ge.s32.totalorder %s17_s24, 4  }
 0x27f   :  { %16 = sbr.rel (!%p14_p4) target bundleno = 1 (0x1), region = 92 }

</bundles_post_ra>
